<compile_context>
chip_gen: v7x
topology: tpu7x:2x2x1
jax: 0.10.0
libtpu: 0.0.40
codegen_flags: <defaults>
</compile_context>

<pallas_src>
import functools

import jax
import jax.numpy as jnp
from jax.experimental import pallas as pl
from jax.experimental.pallas import tpu as pltpu


# ---- packed-parameter layout (static indices) --------------------------------
# weight slab: 8 column bands, each 128-lane aligned
(W_I, W_H, W_QKV, W_O, W_FC1, W_FC2V, W_FC2AH, W_FC2AY) = range(8)
# bias table rows (width 3P; gate/QKV rows use [0:P | P:2P | 2P:3P] segments)
(B_I, B_H, B_QKV, B_O, B_FC1, B_FC2V, B_OVW, B_FC2A, B_OAW, B_OVB, B_OAB) = range(11)


def qnet_kernel(choose_action, x_ref, y_ref, w_ref, b_ref, qsa_ref):
    f32 = jnp.float32
    B, T, P = x_ref.shape                       # x pre-padded to P columns
    C = y_ref.shape[1]
    P3 = 3 * P
    band = w_ref.shape[1] // 8                  # 128-aligned column band width

    def wblk(i, cols):
        return w_ref[:, i * band:i * band + cols]        # (P, cols), aligned start

    bvals = b_ref[...]                                    # (nb, 3P) one small load

    def brow(i, cols):
        return bvals[i:i + 1, :cols]                      # (1, cols)

    def dot(a, b):
        return jnp.dot(a, b, preferred_element_type=f32)

    # ---- time-parallel fused input projection: ONE (B*T,P)@(P,3P) matmul ----
    x2d = x_ref[...].reshape(B * T, P)
    gi = dot(x2d, wblk(W_I, P3)) + brow(B_I, P3)          # (B*T, 3P)
    gi = gi.reshape(B, T, P3)

    # ---- GRU recurrence: ONE fused h-matmul per step on the serial path -----
    w_h = wblk(W_H, P3)                                   # (P, 3P)
    b_h = jnp.broadcast_to(brow(B_H, P3), (B, P3))        # hoisted broadcast

    h = jnp.zeros((B, P), f32)
    outs = []
    for t in range(T):                                    # T static -> unrolled
        gh = dot(h, w_h) + b_h                            # (B, 3P)
        gi_t = gi[:, t, :]                                # (B, 3P), off-chain
        r = jax.nn.sigmoid(gi_t[:, 0:P] + gh[:, 0:P])
        z = jax.nn.sigmoid(gi_t[:, P:2 * P] + gh[:, P:2 * P])
        n = jnp.tanh(gi_t[:, 2 * P:P3] + r * gh[:, 2 * P:P3])
        h = (1.0 - z) * n + z * h
        outs.append(jnp.tanh(h))                          # self.tanh(out) fused
    out2d = jnp.concatenate(outs, axis=0)                 # (T*B, P) time-major

    # ---- single-head attention over the BATCH axis (batch_first=False quirk)
    # one fused QKV matmul; W_q/b_q already carry the 1/sqrt(D) scale.
    qkv = dot(out2d, wblk(W_QKV, P3)) + brow(B_QKV, P3)   # (T*B, 3P)
    qkv = qkv.reshape(T, B, P3)
    q = qkv[:, :, 0:P]
    k = qkv[:, :, P:2 * P]
    v = qkv[:, :, 2 * P:P3]

    # B x B scores / weighted sum on VPU/XLU (no MXU for 2x2 tiles).
    scores = jnp.concatenate(
        [jnp.sum(q * k[:, c:c + 1, :], axis=-1, keepdims=True) for c in range(B)],
        axis=-1)                                          # (T, B, B)
    scores = scores - jnp.max(scores, axis=-1, keepdims=True)
    p = jnp.exp(scores)
    p = p * pl.reciprocal(jnp.sum(p, axis=-1, keepdims=True), approx=True)
    attn = p[:, :, 0:1] * v[:, 0:1, :]
    for c in range(1, B):
        attn = attn + p[:, :, c:c + 1] * v[:, c:c + 1, :]  # (T, B, P)

    # torch.sum(output, dim=1, keepdim=True) == sum over the time axis here;
    # out_proj is linear -> sum first, project once (bias counted T times).
    pooled = dot(jnp.sum(attn, axis=0), wblk(W_O, P)) + float(T) * brow(B_O, P)

    # ---- dueling heads -------------------------------------------------------
    x1 = jax.nn.relu(dot(pooled, wblk(W_FC1, P)) + brow(B_FC1, P))      # (B, P)

    hv = jax.nn.relu(dot(x1, wblk(W_FC2V, P)) + brow(B_FC2V, P))        # (B, P)
    value = (jnp.sum(hv * brow(B_OVW, P), axis=-1, keepdims=True)
             + brow(B_OVB, 1))                                          # (B, 1)

    # fc2_advantage input is the concat [hidden | emb]: two matmuls + add.
    y2d = y_ref[...].reshape(B * C, P)                                  # flattened
    a_y = dot(y2d, wblk(W_FC2AY, P)).reshape(B, C, P)                   # (B, C, P)
    a_h = dot(x1, wblk(W_FC2AH, P))                                     # (B, P)
    ha = jax.nn.relu(a_h[:, None, :] + a_y + brow(B_FC2A, P))
    adv = jnp.sum(ha * brow(B_OAW, P), axis=-1) + brow(B_OAB, 1)        # (B, C)

    if choose_action:
        qsa = adv + value - jnp.mean(adv, axis=1, keepdims=True)
    else:
        qsa = adv + value
    qsa_ref[...] = qsa.astype(qsa_ref.dtype)


# ------------------------- parameter packing (do ONCE) ------------------------
def pack_params(params):
    """Pre-transpose, fuse gates/QKV, fold the attention scale, zero-pad to P,
    and pack everything lane-dense into one weight slab + one bias table."""
    D = params['w_hh'].shape[1]
    Dx = params['w_ih'].shape[1]
    H = params['fc1_w'].shape[0]
    E = params['fc2a_wy'].shape[1]
    P = int(-(-max(Dx, D, H, E, 8) // 8) * 8)            # single pad dim (x8)
    P3 = 3 * P
    BAND = int(-(-P3 // 128) * 128)                      # 128-aligned band width

    def padm(m):                                         # (r,c) -> (P,P)
        r, c = m.shape
        return jnp.pad(m, ((0, P - r), (0, P - c)))

    def fuse3(a, b, c):                                  # three (in,out) -> (P,3P)
        return jnp.concatenate([padm(a), padm(b), padm(c)], axis=1)

    w_ih, w_hh = params['w_ih'], params['w_hh']
    scale = 1.0 / float(D) ** 0.5                        # fold MHA scale into q

    blocks = [
        fuse3(w_ih[0:D].T, w_ih[D:2 * D].T, w_ih[2 * D:3 * D].T),        # W_I
        fuse3(w_hh[0:D].T, w_hh[D:2 * D].T, w_hh[2 * D:3 * D].T),        # W_H
        fuse3(params['w_q'].T * scale, params['w_k'].T, params['w_v'].T),  # W_QKV
        padm(params['w_o'].T),                                           # W_O
        padm(params['fc1_w'].T),                                         # W_FC1
        padm(params['fc2v_w'].T),                                        # W_FC2V
        padm(params['fc2a_wh'].T),                                       # W_FC2AH
        padm(params['fc2a_wy'].T),                                       # W_FC2AY
    ]

    def padband(b):
        return jnp.pad(b, ((0, 0), (0, BAND - b.shape[1])))

    mats = jnp.concatenate([padband(b) for b in blocks], axis=1)   # (P, 8*BAND)

    def padr(v, width):
        return jnp.pad(v, ((0, 0), (0, width - v.shape[1])))

    def fuse3b(a, b, c):
        return jnp.concatenate([padr(a, P), padr(b, P), padr(c, P)], axis=1)

    b_ih, b_hh = params['b_ih'], params['b_hh']
    rows = [
        fuse3b(b_ih[:, 0:D], b_ih[:, D:2 * D], b_ih[:, 2 * D:3 * D]),    # B_I
        fuse3b(b_hh[:, 0:D], b_hh[:, D:2 * D], b_hh[:, 2 * D:3 * D]),    # B_H
        fuse3b(params['b_q'] * scale, params['b_k'], params['b_v']),     # B_QKV
        padr(params['b_o'], P3),                                         # B_O
        padr(params['fc1_b'], P3),                                       # B_FC1
        padr(params['fc2v_b'], P3),                                      # B_FC2V
        padr(params['ov_w'], P3),                                        # B_OVW
        padr(params['fc2a_b'], P3),                                      # B_FC2A
        padr(params['oa_w'], P3),                                        # B_OAW
        padr(params['ov_b'], P3),                                        # B_OVB
        padr(params['oa_b'], P3),                                        # B_OAB
    ]
    brows = jnp.concatenate(rows, axis=0)                                # (11, 3P)
    nb = int(-(-brows.shape[0] // 8) * 8)
    biases = jnp.pad(brows, ((0, nb - brows.shape[0]), (0, 0)))          # (16, 3P)
    return mats, biases


# ------------------------- wrappers -------------------------------------------
def _qnet_pallas(mats, biases, x, y, choose_action):
    B, T, Dx = x.shape
    C, E = y.shape[1], y.shape[2]
    P = mats.shape[0]
    # Pad the activations to the padded width; padded weight rows are zero so
    # the pad columns contribute nothing.
    xp = jnp.pad(x.astype(jnp.float32), ((0, 0), (0, 0), (0, P - Dx)))
    yp = jnp.pad(y.astype(jnp.float32), ((0, 0), (0, 0), (0, P - E)))

    vmem = lambda: pl.BlockSpec(memory_space=pltpu.MemorySpace.VMEM)
    fn = pl.pallas_call(
        functools.partial(qnet_kernel, choose_action),
        out_shape=jax.ShapeDtypeStruct((B, C), jnp.float32),
        in_specs=[vmem() for _ in range(4)],
        out_specs=vmem(),
    )
    return fn(xp, yp, mats, biases)


@functools.partial(jax.jit, static_argnames=("choose_action",))
def qnet_forward_packed(packed, x, y, choose_action=True):
    """Fast path: params already packed once via pack_params()."""
    mats, biases = packed
    return _qnet_pallas(mats, biases, x, y, choose_action)


@functools.partial(jax.jit, static_argnames=("choose_action",))
def qnet_forward(params, x, y, choose_action=True):
    """Convenience path: packs per call (still jitted/fused)."""
    mats, biases = pack_params(params)
    return _qnet_pallas(mats, biases, x, y, choose_action)


# ------------------------- pure-JAX reference --------------------------------
def qnet_reference(params, x, y, choose_action=True):
    D = params['w_hh'].shape[1]

    def step(h, x_t):
        gi = x_t @ params['w_ih'].T + params['b_ih']
        gh = h @ params['w_hh'].T + params['b_hh']
        r = jax.nn.sigmoid(gi[:, :D] + gh[:, :D])
        z = jax.nn.sigmoid(gi[:, D:2 * D] + gh[:, D:2 * D])
        n = jnp.tanh(gi[:, 2 * D:] + r * gh[:, 2 * D:])
        h_new = (1.0 - z) * n + z * h
        return h_new, h_new

    _, outs = jax.lax.scan(step, jnp.zeros((x.shape[0], D), jnp.float32),
                           jnp.swapaxes(x, 0, 1))              # (T, B, D)
    out = jnp.tanh(outs)

    q = jnp.einsum('tbd,ed->tbe', out, params['w_q']) + params['b_q']
    k = jnp.einsum('tbd,ed->tbe', out, params['w_k']) + params['b_k']
    v = jnp.einsum('tbd,ed->tbe', out, params['w_v']) + params['b_v']
    scores = jnp.einsum('tbe,tce->tbc', q / jnp.sqrt(jnp.float32(D)), k)
    p = jax.nn.softmax(scores, axis=-1)
    attn = jnp.einsum('tbc,tce->tbe', p, v)
    attn = jnp.einsum('tbe,fe->tbf', attn, params['w_o']) + params['b_o']
    pooled = jnp.sum(attn, axis=0)                             # (B, D)

    x1 = jax.nn.relu(pooled @ params['fc1_w'].T + params['fc1_b'])
    hv = jax.nn.relu(x1 @ params['fc2v_w'].T + params['fc2v_b'])
    value = jnp.sum(hv * params['ov_w'], axis=-1, keepdims=True) + params['ov_b']

    ha = jax.nn.relu(
        (x1 @ params['fc2a_wh'].T)[:, None, :]
        + jnp.einsum('bce,he->bch', y, params['fc2a_wy'])
        + params['fc2a_b'])
    adv = jnp.sum(ha * params['oa_w'], axis=-1) + params['oa_b']
    if choose_action:
        return adv + value - jnp.mean(adv, axis=1, keepdims=True)
    return adv + value


# ------------------------- parameter construction ----------------------------
def make_params(key, candi_num, emb_size, x_dim=30, state_dim=30, hidden_dim=30):
    D, H, E, Dx = state_dim, hidden_dim, emb_size, x_dim
    shapes = dict(
        w_ih=(3 * D, Dx), w_hh=(3 * D, D), b_ih=(1, 3 * D), b_hh=(1, 3 * D),
        w_q=(D, D), w_k=(D, D), w_v=(D, D),
        b_q=(1, D), b_k=(1, D), b_v=(1, D),
        w_o=(D, D), b_o=(1, D),
        fc1_w=(H, D), fc1_b=(1, H),
        fc2v_w=(H, H), fc2v_b=(1, H), ov_w=(1, H), ov_b=(1, 1),
        fc2a_wh=(H, H), fc2a_wy=(H, E), fc2a_b=(1, H),
        oa_w=(1, H), oa_b=(1, 1),
    )
    params = {}
    keys = jax.random.split(key, len(shapes))
    for k, (name, shp) in zip(keys, sorted(shapes.items())):
        params[name] = 0.1 * jax.random.normal(k, shp, dtype=jnp.float32)
    return params


if __name__ == "__main__":
    B, T = 2, 8
    x_dim = state_dim = hidden_dim = 30
    candi_num, emb_size = 10, 16

    root = jax.random.PRNGKey(0)
    kp, kx, ky = jax.random.split(root, 3)
    params = make_params(kp, candi_num, emb_size, x_dim, state_dim, hidden_dim)
    x = jax.random.normal(kx, (B, T, x_dim), dtype=jnp.float32)
    y = jax.random.normal(ky, (B, candi_num, emb_size), dtype=jnp.float32)

    # Pack once (out of the per-call path), then run the jitted packed forward.
    packed = pack_params(params)
    packed = tuple(jax.block_until_ready(p) for p in packed)

    qsa = jax.block_until_ready(qnet_forward_packed(packed, x, y, choose_action=True))
    qsa_ref = jax.block_until_ready(qnet_reference(params, x, y, choose_action=True))

    assert qsa.shape == (B, candi_num)
    # 2e-3 tolerance: pl.reciprocal(approx=True) in the softmax is the only
    # deliberate approximation (weights are kept in f32 on purpose).
    err = float(jnp.max(jnp.abs(qsa - qsa_ref)))
    assert err < 2e-3, f"mismatch vs pure-JAX reference: {err}"

    print("KERNEL_OK")
</pallas_src>

<mosaic_0001>
module attributes {stable_mosaic.version = 11 : i64} {
  func.func @qnet_kernel(%arg0: memref<2x8x32xf32, #tpu.memory_space<vmem>>, %arg1: memref<2x10x32xf32, #tpu.memory_space<vmem>>, %arg2: memref<32x1024xf32, #tpu.memory_space<vmem>>, %arg3: memref<16x96xf32, #tpu.memory_space<vmem>>, %arg4: memref<2x10xf32, #tpu.memory_space<vmem>>) attributes {dimension_semantics = [], scalar_prefetch = 0 : i64, scratch_operands = 0 : i64, tpu.core_type = #tpu.core_type<tc>} {
    %c0 = arith.constant 0 : index
    %c0_0 = arith.constant 0 : index
    %0 = vector.load %arg3[%c0, %c0_0] : memref<16x96xf32, #tpu.memory_space<vmem>>, vector<16x96xf32>
    %c0_1 = arith.constant 0 : index
    %c0_2 = arith.constant 0 : index
    %c0_3 = arith.constant 0 : index
    %1 = vector.load %arg0[%c0_1, %c0_2, %c0_3] : memref<2x8x32xf32, #tpu.memory_space<vmem>>, vector<2x8x32xf32>
    %2 = vector.shape_cast %1 : vector<2x8x32xf32> to vector<16x32xf32>
    %c0_4 = arith.constant 0 : index
    %c0_5 = arith.constant 0 : index
    %3 = vector.load %arg2[%c0_4, %c0_5] : memref<32x1024xf32, #tpu.memory_space<vmem>>, vector<32x96xf32>
    %cst = arith.constant dense<0.000000e+00> : vector<16x96xf32>
    %4 = tpu.matmul %2, %3, %cst {dimension_numbers = #tpu.dot_dimension_numbers<[1], [0], [0], [1], [0, 0, 1, 1], [], []>} : vector<16x32xf32>, vector<32x96xf32>, vector<16x96xf32> -> vector<16x96xf32>
    %5 = vector.extract_strided_slice %0 {offsets = [0, 0], sizes = [1, 96], strides = [1, 1]} : vector<16x96xf32> to vector<1x96xf32>
    %6 = vector.broadcast %5 : vector<1x96xf32> to vector<16x96xf32>
    %7 = arith.addf %4, %6 : vector<16x96xf32>
    %8 = vector.shape_cast %7 : vector<16x96xf32> to vector<2x8x96xf32>
    %c0_6 = arith.constant 0 : index
    %c128 = arith.constant 128 : index
    %9 = vector.load %arg2[%c0_6, %c128] : memref<32x1024xf32, #tpu.memory_space<vmem>>, vector<32x96xf32>
    %10 = vector.extract_strided_slice %0 {offsets = [1, 0], sizes = [1, 96], strides = [1, 1]} : vector<16x96xf32> to vector<1x96xf32>
    %11 = vector.shape_cast %10 : vector<1x96xf32> to vector<1x96xf32>
    %12 = vector.broadcast %11 : vector<1x96xf32> to vector<2x96xf32>
    %cst_7 = arith.constant 0.000000e+00 : f32
    %13 = vector.broadcast %cst_7 : f32 to vector<2x32xf32>
    %cst_8 = arith.constant dense<0.000000e+00> : vector<2x96xf32>
    %14 = tpu.matmul %13, %9, %cst_8 {dimension_numbers = #tpu.dot_dimension_numbers<[1], [0], [0], [1], [0, 0, 1, 1], [], []>} : vector<2x32xf32>, vector<32x96xf32>, vector<2x96xf32> -> vector<2x96xf32>
    %15 = arith.addf %14, %12 : vector<2x96xf32>
    %16 = vector.extract_strided_slice %8 {offsets = [0, 0, 0], sizes = [2, 1, 96], strides = [1, 1, 1]} : vector<2x8x96xf32> to vector<2x1x96xf32>
    %17 = vector.shape_cast %16 : vector<2x1x96xf32> to vector<2x96xf32>
    %18 = vector.extract_strided_slice %17 {offsets = [0, 0], sizes = [2, 32], strides = [1, 1]} : vector<2x96xf32> to vector<2x32xf32>
    %19 = vector.extract_strided_slice %15 {offsets = [0, 0], sizes = [2, 32], strides = [1, 1]} : vector<2x96xf32> to vector<2x32xf32>
    %20 = arith.addf %18, %19 : vector<2x32xf32>
    %21 = arith.negf %20 : vector<2x32xf32>
    %22 = math.exp %21 : vector<2x32xf32>
    %cst_9 = arith.constant 1.000000e+00 : f32
    %23 = vector.broadcast %cst_9 : f32 to vector<2x32xf32>
    %24 = arith.addf %23, %22 : vector<2x32xf32>
    %25 = arith.divf %23, %24 : vector<2x32xf32>
    %26 = vector.extract_strided_slice %17 {offsets = [0, 32], sizes = [2, 32], strides = [1, 1]} : vector<2x96xf32> to vector<2x32xf32>
    %27 = vector.extract_strided_slice %15 {offsets = [0, 32], sizes = [2, 32], strides = [1, 1]} : vector<2x96xf32> to vector<2x32xf32>
    %28 = arith.addf %26, %27 : vector<2x32xf32>
    %29 = arith.negf %28 : vector<2x32xf32>
    %30 = math.exp %29 : vector<2x32xf32>
    %cst_10 = arith.constant 1.000000e+00 : f32
    %31 = vector.broadcast %cst_10 : f32 to vector<2x32xf32>
    %32 = arith.addf %31, %30 : vector<2x32xf32>
    %33 = arith.divf %31, %32 : vector<2x32xf32>
    %34 = vector.extract_strided_slice %17 {offsets = [0, 64], sizes = [2, 32], strides = [1, 1]} : vector<2x96xf32> to vector<2x32xf32>
    %35 = vector.extract_strided_slice %15 {offsets = [0, 64], sizes = [2, 32], strides = [1, 1]} : vector<2x96xf32> to vector<2x32xf32>
    %36 = arith.mulf %25, %35 : vector<2x32xf32>
    %37 = arith.addf %34, %36 : vector<2x32xf32>
    %38 = math.tanh %37 : vector<2x32xf32>
    %cst_11 = arith.constant 1.000000e+00 : f32
    %39 = vector.broadcast %cst_11 : f32 to vector<2x32xf32>
    %40 = arith.subf %39, %33 : vector<2x32xf32>
    %41 = arith.mulf %40, %38 : vector<2x32xf32>
    %42 = arith.mulf %33, %13 : vector<2x32xf32>
    %43 = arith.addf %41, %42 : vector<2x32xf32>
    %44 = math.tanh %43 : vector<2x32xf32>
    %cst_12 = arith.constant dense<0.000000e+00> : vector<2x96xf32>
    %45 = tpu.matmul %43, %9, %cst_12 {dimension_numbers = #tpu.dot_dimension_numbers<[1], [0], [0], [1], [0, 0, 1, 1], [], []>} : vector<2x32xf32>, vector<32x96xf32>, vector<2x96xf32> -> vector<2x96xf32>
    %46 = arith.addf %45, %12 : vector<2x96xf32>
    %47 = vector.extract_strided_slice %8 {offsets = [0, 1, 0], sizes = [2, 1, 96], strides = [1, 1, 1]} : vector<2x8x96xf32> to vector<2x1x96xf32>
    %48 = vector.shape_cast %47 : vector<2x1x96xf32> to vector<2x96xf32>
    %49 = vector.extract_strided_slice %48 {offsets = [0, 0], sizes = [2, 32], strides = [1, 1]} : vector<2x96xf32> to vector<2x32xf32>
    %50 = vector.extract_strided_slice %46 {offsets = [0, 0], sizes = [2, 32], strides = [1, 1]} : vector<2x96xf32> to vector<2x32xf32>
    %51 = arith.addf %49, %50 : vector<2x32xf32>
    %52 = arith.negf %51 : vector<2x32xf32>
    %53 = math.exp %52 : vector<2x32xf32>
    %cst_13 = arith.constant 1.000000e+00 : f32
    %54 = vector.broadcast %cst_13 : f32 to vector<2x32xf32>
    %55 = arith.addf %54, %53 : vector<2x32xf32>
    %56 = arith.divf %54, %55 : vector<2x32xf32>
    %57 = vector.extract_strided_slice %48 {offsets = [0, 32], sizes = [2, 32], strides = [1, 1]} : vector<2x96xf32> to vector<2x32xf32>
    %58 = vector.extract_strided_slice %46 {offsets = [0, 32], sizes = [2, 32], strides = [1, 1]} : vector<2x96xf32> to vector<2x32xf32>
    %59 = arith.addf %57, %58 : vector<2x32xf32>
    %60 = arith.negf %59 : vector<2x32xf32>
    %61 = math.exp %60 : vector<2x32xf32>
    %cst_14 = arith.constant 1.000000e+00 : f32
    %62 = vector.broadcast %cst_14 : f32 to vector<2x32xf32>
    %63 = arith.addf %62, %61 : vector<2x32xf32>
    %64 = arith.divf %62, %63 : vector<2x32xf32>
    %65 = vector.extract_strided_slice %48 {offsets = [0, 64], sizes = [2, 32], strides = [1, 1]} : vector<2x96xf32> to vector<2x32xf32>
    %66 = vector.extract_strided_slice %46 {offsets = [0, 64], sizes = [2, 32], strides = [1, 1]} : vector<2x96xf32> to vector<2x32xf32>
    %67 = arith.mulf %56, %66 : vector<2x32xf32>
    %68 = arith.addf %65, %67 : vector<2x32xf32>
    %69 = math.tanh %68 : vector<2x32xf32>
    %cst_15 = arith.constant 1.000000e+00 : f32
    %70 = vector.broadcast %cst_15 : f32 to vector<2x32xf32>
    %71 = arith.subf %70, %64 : vector<2x32xf32>
    %72 = arith.mulf %71, %69 : vector<2x32xf32>
    %73 = arith.mulf %64, %43 : vector<2x32xf32>
    %74 = arith.addf %72, %73 : vector<2x32xf32>
    %75 = math.tanh %74 : vector<2x32xf32>
    %cst_16 = arith.constant dense<0.000000e+00> : vector<2x96xf32>
    %76 = tpu.matmul %74, %9, %cst_16 {dimension_numbers = #tpu.dot_dimension_numbers<[1], [0], [0], [1], [0, 0, 1, 1], [], []>} : vector<2x32xf32>, vector<32x96xf32>, vector<2x96xf32> -> vector<2x96xf32>
    %77 = arith.addf %76, %12 : vector<2x96xf32>
    %78 = vector.extract_strided_slice %8 {offsets = [0, 2, 0], sizes = [2, 1, 96], strides = [1, 1, 1]} : vector<2x8x96xf32> to vector<2x1x96xf32>
    %79 = vector.shape_cast %78 : vector<2x1x96xf32> to vector<2x96xf32>
    %80 = vector.extract_strided_slice %79 {offsets = [0, 0], sizes = [2, 32], strides = [1, 1]} : vector<2x96xf32> to vector<2x32xf32>
    %81 = vector.extract_strided_slice %77 {offsets = [0, 0], sizes = [2, 32], strides = [1, 1]} : vector<2x96xf32> to vector<2x32xf32>
    %82 = arith.addf %80, %81 : vector<2x32xf32>
    %83 = arith.negf %82 : vector<2x32xf32>
    %84 = math.exp %83 : vector<2x32xf32>
    %cst_17 = arith.constant 1.000000e+00 : f32
    %85 = vector.broadcast %cst_17 : f32 to vector<2x32xf32>
    %86 = arith.addf %85, %84 : vector<2x32xf32>
    %87 = arith.divf %85, %86 : vector<2x32xf32>
    %88 = vector.extract_strided_slice %79 {offsets = [0, 32], sizes = [2, 32], strides = [1, 1]} : vector<2x96xf32> to vector<2x32xf32>
    %89 = vector.extract_strided_slice %77 {offsets = [0, 32], sizes = [2, 32], strides = [1, 1]} : vector<2x96xf32> to vector<2x32xf32>
    %90 = arith.addf %88, %89 : vector<2x32xf32>
    %91 = arith.negf %90 : vector<2x32xf32>
    %92 = math.exp %91 : vector<2x32xf32>
    %cst_18 = arith.constant 1.000000e+00 : f32
    %93 = vector.broadcast %cst_18 : f32 to vector<2x32xf32>
    %94 = arith.addf %93, %92 : vector<2x32xf32>
    %95 = arith.divf %93, %94 : vector<2x32xf32>
    %96 = vector.extract_strided_slice %79 {offsets = [0, 64], sizes = [2, 32], strides = [1, 1]} : vector<2x96xf32> to vector<2x32xf32>
    %97 = vector.extract_strided_slice %77 {offsets = [0, 64], sizes = [2, 32], strides = [1, 1]} : vector<2x96xf32> to vector<2x32xf32>
    %98 = arith.mulf %87, %97 : vector<2x32xf32>
    %99 = arith.addf %96, %98 : vector<2x32xf32>
    %100 = math.tanh %99 : vector<2x32xf32>
    %cst_19 = arith.constant 1.000000e+00 : f32
    %101 = vector.broadcast %cst_19 : f32 to vector<2x32xf32>
    %102 = arith.subf %101, %95 : vector<2x32xf32>
    %103 = arith.mulf %102, %100 : vector<2x32xf32>
    %104 = arith.mulf %95, %74 : vector<2x32xf32>
    %105 = arith.addf %103, %104 : vector<2x32xf32>
    %106 = math.tanh %105 : vector<2x32xf32>
    %cst_20 = arith.constant dense<0.000000e+00> : vector<2x96xf32>
    %107 = tpu.matmul %105, %9, %cst_20 {dimension_numbers = #tpu.dot_dimension_numbers<[1], [0], [0], [1], [0, 0, 1, 1], [], []>} : vector<2x32xf32>, vector<32x96xf32>, vector<2x96xf32> -> vector<2x96xf32>
    %108 = arith.addf %107, %12 : vector<2x96xf32>
    %109 = vector.extract_strided_slice %8 {offsets = [0, 3, 0], sizes = [2, 1, 96], strides = [1, 1, 1]} : vector<2x8x96xf32> to vector<2x1x96xf32>
    %110 = vector.shape_cast %109 : vector<2x1x96xf32> to vector<2x96xf32>
    %111 = vector.extract_strided_slice %110 {offsets = [0, 0], sizes = [2, 32], strides = [1, 1]} : vector<2x96xf32> to vector<2x32xf32>
    %112 = vector.extract_strided_slice %108 {offsets = [0, 0], sizes = [2, 32], strides = [1, 1]} : vector<2x96xf32> to vector<2x32xf32>
    %113 = arith.addf %111, %112 : vector<2x32xf32>
    %114 = arith.negf %113 : vector<2x32xf32>
    %115 = math.exp %114 : vector<2x32xf32>
    %cst_21 = arith.constant 1.000000e+00 : f32
    %116 = vector.broadcast %cst_21 : f32 to vector<2x32xf32>
    %117 = arith.addf %116, %115 : vector<2x32xf32>
    %118 = arith.divf %116, %117 : vector<2x32xf32>
    %119 = vector.extract_strided_slice %110 {offsets = [0, 32], sizes = [2, 32], strides = [1, 1]} : vector<2x96xf32> to vector<2x32xf32>
    %120 = vector.extract_strided_slice %108 {offsets = [0, 32], sizes = [2, 32], strides = [1, 1]} : vector<2x96xf32> to vector<2x32xf32>
    %121 = arith.addf %119, %120 : vector<2x32xf32>
    %122 = arith.negf %121 : vector<2x32xf32>
    %123 = math.exp %122 : vector<2x32xf32>
    %cst_22 = arith.constant 1.000000e+00 : f32
    %124 = vector.broadcast %cst_22 : f32 to vector<2x32xf32>
    %125 = arith.addf %124, %123 : vector<2x32xf32>
    %126 = arith.divf %124, %125 : vector<2x32xf32>
    %127 = vector.extract_strided_slice %110 {offsets = [0, 64], sizes = [2, 32], strides = [1, 1]} : vector<2x96xf32> to vector<2x32xf32>
    %128 = vector.extract_strided_slice %108 {offsets = [0, 64], sizes = [2, 32], strides = [1, 1]} : vector<2x96xf32> to vector<2x32xf32>
    %129 = arith.mulf %118, %128 : vector<2x32xf32>
    %130 = arith.addf %127, %129 : vector<2x32xf32>
    %131 = math.tanh %130 : vector<2x32xf32>
    %cst_23 = arith.constant 1.000000e+00 : f32
    %132 = vector.broadcast %cst_23 : f32 to vector<2x32xf32>
    %133 = arith.subf %132, %126 : vector<2x32xf32>
    %134 = arith.mulf %133, %131 : vector<2x32xf32>
    %135 = arith.mulf %126, %105 : vector<2x32xf32>
    %136 = arith.addf %134, %135 : vector<2x32xf32>
    %137 = math.tanh %136 : vector<2x32xf32>
    %cst_24 = arith.constant dense<0.000000e+00> : vector<2x96xf32>
    %138 = tpu.matmul %136, %9, %cst_24 {dimension_numbers = #tpu.dot_dimension_numbers<[1], [0], [0], [1], [0, 0, 1, 1], [], []>} : vector<2x32xf32>, vector<32x96xf32>, vector<2x96xf32> -> vector<2x96xf32>
    %139 = arith.addf %138, %12 : vector<2x96xf32>
    %140 = vector.extract_strided_slice %8 {offsets = [0, 4, 0], sizes = [2, 1, 96], strides = [1, 1, 1]} : vector<2x8x96xf32> to vector<2x1x96xf32>
    %141 = vector.shape_cast %140 : vector<2x1x96xf32> to vector<2x96xf32>
    %142 = vector.extract_strided_slice %141 {offsets = [0, 0], sizes = [2, 32], strides = [1, 1]} : vector<2x96xf32> to vector<2x32xf32>
    %143 = vector.extract_strided_slice %139 {offsets = [0, 0], sizes = [2, 32], strides = [1, 1]} : vector<2x96xf32> to vector<2x32xf32>
    %144 = arith.addf %142, %143 : vector<2x32xf32>
    %145 = arith.negf %144 : vector<2x32xf32>
    %146 = math.exp %145 : vector<2x32xf32>
    %cst_25 = arith.constant 1.000000e+00 : f32
    %147 = vector.broadcast %cst_25 : f32 to vector<2x32xf32>
    %148 = arith.addf %147, %146 : vector<2x32xf32>
    %149 = arith.divf %147, %148 : vector<2x32xf32>
    %150 = vector.extract_strided_slice %141 {offsets = [0, 32], sizes = [2, 32], strides = [1, 1]} : vector<2x96xf32> to vector<2x32xf32>
    %151 = vector.extract_strided_slice %139 {offsets = [0, 32], sizes = [2, 32], strides = [1, 1]} : vector<2x96xf32> to vector<2x32xf32>
    %152 = arith.addf %150, %151 : vector<2x32xf32>
    %153 = arith.negf %152 : vector<2x32xf32>
    %154 = math.exp %153 : vector<2x32xf32>
    %cst_26 = arith.constant 1.000000e+00 : f32
    %155 = vector.broadcast %cst_26 : f32 to vector<2x32xf32>
    %156 = arith.addf %155, %154 : vector<2x32xf32>
    %157 = arith.divf %155, %156 : vector<2x32xf32>
    %158 = vector.extract_strided_slice %141 {offsets = [0, 64], sizes = [2, 32], strides = [1, 1]} : vector<2x96xf32> to vector<2x32xf32>
    %159 = vector.extract_strided_slice %139 {offsets = [0, 64], sizes = [2, 32], strides = [1, 1]} : vector<2x96xf32> to vector<2x32xf32>
    %160 = arith.mulf %149, %159 : vector<2x32xf32>
    %161 = arith.addf %158, %160 : vector<2x32xf32>
    %162 = math.tanh %161 : vector<2x32xf32>
    %cst_27 = arith.constant 1.000000e+00 : f32
    %163 = vector.broadcast %cst_27 : f32 to vector<2x32xf32>
    %164 = arith.subf %163, %157 : vector<2x32xf32>
    %165 = arith.mulf %164, %162 : vector<2x32xf32>
    %166 = arith.mulf %157, %136 : vector<2x32xf32>
    %167 = arith.addf %165, %166 : vector<2x32xf32>
    %168 = math.tanh %167 : vector<2x32xf32>
    %cst_28 = arith.constant dense<0.000000e+00> : vector<2x96xf32>
    %169 = tpu.matmul %167, %9, %cst_28 {dimension_numbers = #tpu.dot_dimension_numbers<[1], [0], [0], [1], [0, 0, 1, 1], [], []>} : vector<2x32xf32>, vector<32x96xf32>, vector<2x96xf32> -> vector<2x96xf32>
    %170 = arith.addf %169, %12 : vector<2x96xf32>
    %171 = vector.extract_strided_slice %8 {offsets = [0, 5, 0], sizes = [2, 1, 96], strides = [1, 1, 1]} : vector<2x8x96xf32> to vector<2x1x96xf32>
    %172 = vector.shape_cast %171 : vector<2x1x96xf32> to vector<2x96xf32>
    %173 = vector.extract_strided_slice %172 {offsets = [0, 0], sizes = [2, 32], strides = [1, 1]} : vector<2x96xf32> to vector<2x32xf32>
    %174 = vector.extract_strided_slice %170 {offsets = [0, 0], sizes = [2, 32], strides = [1, 1]} : vector<2x96xf32> to vector<2x32xf32>
    %175 = arith.addf %173, %174 : vector<2x32xf32>
    %176 = arith.negf %175 : vector<2x32xf32>
    %177 = math.exp %176 : vector<2x32xf32>
    %cst_29 = arith.constant 1.000000e+00 : f32
    %178 = vector.broadcast %cst_29 : f32 to vector<2x32xf32>
    %179 = arith.addf %178, %177 : vector<2x32xf32>
    %180 = arith.divf %178, %179 : vector<2x32xf32>
    %181 = vector.extract_strided_slice %172 {offsets = [0, 32], sizes = [2, 32], strides = [1, 1]} : vector<2x96xf32> to vector<2x32xf32>
    %182 = vector.extract_strided_slice %170 {offsets = [0, 32], sizes = [2, 32], strides = [1, 1]} : vector<2x96xf32> to vector<2x32xf32>
    %183 = arith.addf %181, %182 : vector<2x32xf32>
    %184 = arith.negf %183 : vector<2x32xf32>
    %185 = math.exp %184 : vector<2x32xf32>
    %cst_30 = arith.constant 1.000000e+00 : f32
    %186 = vector.broadcast %cst_30 : f32 to vector<2x32xf32>
    %187 = arith.addf %186, %185 : vector<2x32xf32>
    %188 = arith.divf %186, %187 : vector<2x32xf32>
    %189 = vector.extract_strided_slice %172 {offsets = [0, 64], sizes = [2, 32], strides = [1, 1]} : vector<2x96xf32> to vector<2x32xf32>
    %190 = vector.extract_strided_slice %170 {offsets = [0, 64], sizes = [2, 32], strides = [1, 1]} : vector<2x96xf32> to vector<2x32xf32>
    %191 = arith.mulf %180, %190 : vector<2x32xf32>
    %192 = arith.addf %189, %191 : vector<2x32xf32>
    %193 = math.tanh %192 : vector<2x32xf32>
    %cst_31 = arith.constant 1.000000e+00 : f32
    %194 = vector.broadcast %cst_31 : f32 to vector<2x32xf32>
    %195 = arith.subf %194, %188 : vector<2x32xf32>
    %196 = arith.mulf %195, %193 : vector<2x32xf32>
    %197 = arith.mulf %188, %167 : vector<2x32xf32>
    %198 = arith.addf %196, %197 : vector<2x32xf32>
    %199 = math.tanh %198 : vector<2x32xf32>
    %cst_32 = arith.constant dense<0.000000e+00> : vector<2x96xf32>
    %200 = tpu.matmul %198, %9, %cst_32 {dimension_numbers = #tpu.dot_dimension_numbers<[1], [0], [0], [1], [0, 0, 1, 1], [], []>} : vector<2x32xf32>, vector<32x96xf32>, vector<2x96xf32> -> vector<2x96xf32>
    %201 = arith.addf %200, %12 : vector<2x96xf32>
    %202 = vector.extract_strided_slice %8 {offsets = [0, 6, 0], sizes = [2, 1, 96], strides = [1, 1, 1]} : vector<2x8x96xf32> to vector<2x1x96xf32>
    %203 = vector.shape_cast %202 : vector<2x1x96xf32> to vector<2x96xf32>
    %204 = vector.extract_strided_slice %203 {offsets = [0, 0], sizes = [2, 32], strides = [1, 1]} : vector<2x96xf32> to vector<2x32xf32>
    %205 = vector.extract_strided_slice %201 {offsets = [0, 0], sizes = [2, 32], strides = [1, 1]} : vector<2x96xf32> to vector<2x32xf32>
    %206 = arith.addf %204, %205 : vector<2x32xf32>
    %207 = arith.negf %206 : vector<2x32xf32>
    %208 = math.exp %207 : vector<2x32xf32>
    %cst_33 = arith.constant 1.000000e+00 : f32
    %209 = vector.broadcast %cst_33 : f32 to vector<2x32xf32>
    %210 = arith.addf %209, %208 : vector<2x32xf32>
    %211 = arith.divf %209, %210 : vector<2x32xf32>
    %212 = vector.extract_strided_slice %203 {offsets = [0, 32], sizes = [2, 32], strides = [1, 1]} : vector<2x96xf32> to vector<2x32xf32>
    %213 = vector.extract_strided_slice %201 {offsets = [0, 32], sizes = [2, 32], strides = [1, 1]} : vector<2x96xf32> to vector<2x32xf32>
    %214 = arith.addf %212, %213 : vector<2x32xf32>
    %215 = arith.negf %214 : vector<2x32xf32>
    %216 = math.exp %215 : vector<2x32xf32>
    %cst_34 = arith.constant 1.000000e+00 : f32
    %217 = vector.broadcast %cst_34 : f32 to vector<2x32xf32>
    %218 = arith.addf %217, %216 : vector<2x32xf32>
    %219 = arith.divf %217, %218 : vector<2x32xf32>
    %220 = vector.extract_strided_slice %203 {offsets = [0, 64], sizes = [2, 32], strides = [1, 1]} : vector<2x96xf32> to vector<2x32xf32>
    %221 = vector.extract_strided_slice %201 {offsets = [0, 64], sizes = [2, 32], strides = [1, 1]} : vector<2x96xf32> to vector<2x32xf32>
    %222 = arith.mulf %211, %221 : vector<2x32xf32>
    %223 = arith.addf %220, %222 : vector<2x32xf32>
    %224 = math.tanh %223 : vector<2x32xf32>
    %cst_35 = arith.constant 1.000000e+00 : f32
    %225 = vector.broadcast %cst_35 : f32 to vector<2x32xf32>
    %226 = arith.subf %225, %219 : vector<2x32xf32>
    %227 = arith.mulf %226, %224 : vector<2x32xf32>
    %228 = arith.mulf %219, %198 : vector<2x32xf32>
    %229 = arith.addf %227, %228 : vector<2x32xf32>
    %230 = math.tanh %229 : vector<2x32xf32>
    %cst_36 = arith.constant dense<0.000000e+00> : vector<2x96xf32>
    %231 = tpu.matmul %229, %9, %cst_36 {dimension_numbers = #tpu.dot_dimension_numbers<[1], [0], [0], [1], [0, 0, 1, 1], [], []>} : vector<2x32xf32>, vector<32x96xf32>, vector<2x96xf32> -> vector<2x96xf32>
    %232 = arith.addf %231, %12 : vector<2x96xf32>
    %233 = vector.extract_strided_slice %8 {offsets = [0, 7, 0], sizes = [2, 1, 96], strides = [1, 1, 1]} : vector<2x8x96xf32> to vector<2x1x96xf32>
    %234 = vector.shape_cast %233 : vector<2x1x96xf32> to vector<2x96xf32>
    %235 = vector.extract_strided_slice %234 {offsets = [0, 0], sizes = [2, 32], strides = [1, 1]} : vector<2x96xf32> to vector<2x32xf32>
    %236 = vector.extract_strided_slice %232 {offsets = [0, 0], sizes = [2, 32], strides = [1, 1]} : vector<2x96xf32> to vector<2x32xf32>
    %237 = arith.addf %235, %236 : vector<2x32xf32>
    %238 = arith.negf %237 : vector<2x32xf32>
    %239 = math.exp %238 : vector<2x32xf32>
    %cst_37 = arith.constant 1.000000e+00 : f32
    %240 = vector.broadcast %cst_37 : f32 to vector<2x32xf32>
    %241 = arith.addf %240, %239 : vector<2x32xf32>
    %242 = arith.divf %240, %241 : vector<2x32xf32>
    %243 = vector.extract_strided_slice %234 {offsets = [0, 32], sizes = [2, 32], strides = [1, 1]} : vector<2x96xf32> to vector<2x32xf32>
    %244 = vector.extract_strided_slice %232 {offsets = [0, 32], sizes = [2, 32], strides = [1, 1]} : vector<2x96xf32> to vector<2x32xf32>
    %245 = arith.addf %243, %244 : vector<2x32xf32>
    %246 = arith.negf %245 : vector<2x32xf32>
    %247 = math.exp %246 : vector<2x32xf32>
    %cst_38 = arith.constant 1.000000e+00 : f32
    %248 = vector.broadcast %cst_38 : f32 to vector<2x32xf32>
    %249 = arith.addf %248, %247 : vector<2x32xf32>
    %250 = arith.divf %248, %249 : vector<2x32xf32>
    %251 = vector.extract_strided_slice %234 {offsets = [0, 64], sizes = [2, 32], strides = [1, 1]} : vector<2x96xf32> to vector<2x32xf32>
    %252 = vector.extract_strided_slice %232 {offsets = [0, 64], sizes = [2, 32], strides = [1, 1]} : vector<2x96xf32> to vector<2x32xf32>
    %253 = arith.mulf %242, %252 : vector<2x32xf32>
    %254 = arith.addf %251, %253 : vector<2x32xf32>
    %255 = math.tanh %254 : vector<2x32xf32>
    %cst_39 = arith.constant 1.000000e+00 : f32
    %256 = vector.broadcast %cst_39 : f32 to vector<2x32xf32>
    %257 = arith.subf %256, %250 : vector<2x32xf32>
    %258 = arith.mulf %257, %255 : vector<2x32xf32>
    %259 = arith.mulf %250, %229 : vector<2x32xf32>
    %260 = arith.addf %258, %259 : vector<2x32xf32>
    %261 = math.tanh %260 : vector<2x32xf32>
    %262 = tpu.concatenate %44, %75, %106, %137, %168, %199, %230, %261 in 0 : vector<2x32xf32>, vector<2x32xf32>, vector<2x32xf32>, vector<2x32xf32>, vector<2x32xf32>, vector<2x32xf32>, vector<2x32xf32>, vector<2x32xf32> -> vector<16x32xf32>
    %c0_40 = arith.constant 0 : index
    %c256 = arith.constant 256 : index
    %263 = vector.load %arg2[%c0_40, %c256] : memref<32x1024xf32, #tpu.memory_space<vmem>>, vector<32x96xf32>
    %cst_41 = arith.constant dense<0.000000e+00> : vector<16x96xf32>
    %264 = tpu.matmul %262, %263, %cst_41 {dimension_numbers = #tpu.dot_dimension_numbers<[1], [0], [0], [1], [0, 0, 1, 1], [], []>} : vector<16x32xf32>, vector<32x96xf32>, vector<16x96xf32> -> vector<16x96xf32>
    %265 = vector.extract_strided_slice %0 {offsets = [2, 0], sizes = [1, 96], strides = [1, 1]} : vector<16x96xf32> to vector<1x96xf32>
    %266 = vector.broadcast %265 : vector<1x96xf32> to vector<16x96xf32>
    %267 = arith.addf %264, %266 : vector<16x96xf32>
    %268 = vector.shape_cast %267 : vector<16x96xf32> to vector<8x2x96xf32>
    %269 = vector.extract_strided_slice %268 {offsets = [0, 0, 0], sizes = [8, 2, 32], strides = [1, 1, 1]} : vector<8x2x96xf32> to vector<8x2x32xf32>
    %270 = vector.extract_strided_slice %268 {offsets = [0, 0, 32], sizes = [8, 2, 32], strides = [1, 1, 1]} : vector<8x2x96xf32> to vector<8x2x32xf32>
    %271 = vector.extract_strided_slice %268 {offsets = [0, 0, 64], sizes = [8, 2, 32], strides = [1, 1, 1]} : vector<8x2x96xf32> to vector<8x2x32xf32>
    %272 = vector.extract_strided_slice %270 {offsets = [0, 0, 0], sizes = [8, 1, 32], strides = [1, 1, 1]} : vector<8x2x32xf32> to vector<8x1x32xf32>
    %273 = vector.broadcast %272 : vector<8x1x32xf32> to vector<8x2x32xf32>
    %274 = arith.mulf %269, %273 : vector<8x2x32xf32>
    %cst_42 = arith.constant dense<0.000000e+00> : vector<8x2xf32>
    %275 = vector.multi_reduction <add>, %274, %cst_42 [2] : vector<8x2x32xf32> to vector<8x2xf32>
    %276 = vector.shape_cast %275 : vector<8x2xf32> to vector<8x2x1xf32>
    %277 = vector.extract_strided_slice %270 {offsets = [0, 1, 0], sizes = [8, 1, 32], strides = [1, 1, 1]} : vector<8x2x32xf32> to vector<8x1x32xf32>
    %278 = vector.broadcast %277 : vector<8x1x32xf32> to vector<8x2x32xf32>
    %279 = arith.mulf %269, %278 : vector<8x2x32xf32>
    %cst_43 = arith.constant dense<0.000000e+00> : vector<8x2xf32>
    %280 = vector.multi_reduction <add>, %279, %cst_43 [2] : vector<8x2x32xf32> to vector<8x2xf32>
    %281 = vector.shape_cast %280 : vector<8x2xf32> to vector<8x2x1xf32>
    %282 = tpu.concatenate %276, %281 in 2 : vector<8x2x1xf32>, vector<8x2x1xf32> -> vector<8x2x2xf32>
    %cst_44 = arith.constant dense<0xFF800000> : vector<8x2xf32>
    %283 = vector.multi_reduction <maximumf>, %282, %cst_44 [2] : vector<8x2x2xf32> to vector<8x2xf32>
    %284 = vector.shape_cast %283 : vector<8x2xf32> to vector<8x2x1xf32>
    %285 = vector.broadcast %284 : vector<8x2x1xf32> to vector<8x2x2xf32>
    %286 = arith.subf %282, %285 : vector<8x2x2xf32>
    %287 = math.exp %286 : vector<8x2x2xf32>
    %cst_45 = arith.constant dense<0.000000e+00> : vector<8x2xf32>
    %288 = vector.multi_reduction <add>, %287, %cst_45 [2] : vector<8x2x2xf32> to vector<8x2xf32>
    %289 = vector.shape_cast %288 : vector<8x2xf32> to vector<8x2x1xf32>
    %290 = tpu.reciprocal %289 {approx = true} : vector<8x2x1xf32> -> vector<8x2x1xf32>
    %291 = vector.broadcast %290 : vector<8x2x1xf32> to vector<8x2x2xf32>
    %292 = arith.mulf %287, %291 : vector<8x2x2xf32>
    %293 = vector.extract_strided_slice %292 {offsets = [0, 0, 0], sizes = [8, 2, 1], strides = [1, 1, 1]} : vector<8x2x2xf32> to vector<8x2x1xf32>
    %294 = vector.extract_strided_slice %271 {offsets = [0, 0, 0], sizes = [8, 1, 32], strides = [1, 1, 1]} : vector<8x2x32xf32> to vector<8x1x32xf32>
    %295 = vector.broadcast %293 : vector<8x2x1xf32> to vector<8x2x32xf32>
    %296 = vector.broadcast %294 : vector<8x1x32xf32> to vector<8x2x32xf32>
    %297 = arith.mulf %295, %296 : vector<8x2x32xf32>
    %298 = vector.extract_strided_slice %292 {offsets = [0, 0, 1], sizes = [8, 2, 1], strides = [1, 1, 1]} : vector<8x2x2xf32> to vector<8x2x1xf32>
    %299 = vector.extract_strided_slice %271 {offsets = [0, 1, 0], sizes = [8, 1, 32], strides = [1, 1, 1]} : vector<8x2x32xf32> to vector<8x1x32xf32>
    %300 = vector.broadcast %298 : vector<8x2x1xf32> to vector<8x2x32xf32>
    %301 = vector.broadcast %299 : vector<8x1x32xf32> to vector<8x2x32xf32>
    %302 = arith.mulf %300, %301 : vector<8x2x32xf32>
    %303 = arith.addf %297, %302 : vector<8x2x32xf32>
    %cst_46 = arith.constant dense<0.000000e+00> : vector<2x32xf32>
    %304 = vector.multi_reduction <add>, %303, %cst_46 [0] : vector<8x2x32xf32> to vector<2x32xf32>
    %c0_47 = arith.constant 0 : index
    %c384 = arith.constant 384 : index
    %305 = vector.load %arg2[%c0_47, %c384] : memref<32x1024xf32, #tpu.memory_space<vmem>>, vector<32x32xf32>
    %cst_48 = arith.constant dense<0.000000e+00> : vector<2x32xf32>
    %306 = tpu.matmul %304, %305, %cst_48 {dimension_numbers = #tpu.dot_dimension_numbers<[1], [0], [0], [1], [0, 0, 1, 1], [], []>} : vector<2x32xf32>, vector<32x32xf32>, vector<2x32xf32> -> vector<2x32xf32>
    %307 = vector.extract_strided_slice %0 {offsets = [3, 0], sizes = [1, 32], strides = [1, 1]} : vector<16x96xf32> to vector<1x32xf32>
    %cst_49 = arith.constant 8.000000e+00 : f32
    %308 = vector.broadcast %cst_49 : f32 to vector<1x32xf32>
    %309 = arith.mulf %308, %307 : vector<1x32xf32>
    %310 = vector.broadcast %309 : vector<1x32xf32> to vector<2x32xf32>
    %311 = arith.addf %306, %310 : vector<2x32xf32>
    %c0_50 = arith.constant 0 : index
    %c512 = arith.constant 512 : index
    %312 = vector.load %arg2[%c0_50, %c512] : memref<32x1024xf32, #tpu.memory_space<vmem>>, vector<32x32xf32>
    %cst_51 = arith.constant dense<0.000000e+00> : vector<2x32xf32>
    %313 = tpu.matmul %311, %312, %cst_51 {dimension_numbers = #tpu.dot_dimension_numbers<[1], [0], [0], [1], [0, 0, 1, 1], [], []>} : vector<2x32xf32>, vector<32x32xf32>, vector<2x32xf32> -> vector<2x32xf32>
    %314 = vector.extract_strided_slice %0 {offsets = [4, 0], sizes = [1, 32], strides = [1, 1]} : vector<16x96xf32> to vector<1x32xf32>
    %315 = vector.broadcast %314 : vector<1x32xf32> to vector<2x32xf32>
    %316 = arith.addf %313, %315 : vector<2x32xf32>
    %cst_52 = arith.constant 0.000000e+00 : f32
    %317 = vector.broadcast %cst_52 : f32 to vector<2x32xf32>
    %318 = arith.maximumf %316, %317 : vector<2x32xf32>
    %c0_53 = arith.constant 0 : index
    %c640 = arith.constant 640 : index
    %319 = vector.load %arg2[%c0_53, %c640] : memref<32x1024xf32, #tpu.memory_space<vmem>>, vector<32x32xf32>
    %cst_54 = arith.constant dense<0.000000e+00> : vector<2x32xf32>
    %320 = tpu.matmul %318, %319, %cst_54 {dimension_numbers = #tpu.dot_dimension_numbers<[1], [0], [0], [1], [0, 0, 1, 1], [], []>} : vector<2x32xf32>, vector<32x32xf32>, vector<2x32xf32> -> vector<2x32xf32>
    %321 = vector.extract_strided_slice %0 {offsets = [5, 0], sizes = [1, 32], strides = [1, 1]} : vector<16x96xf32> to vector<1x32xf32>
    %322 = vector.broadcast %321 : vector<1x32xf32> to vector<2x32xf32>
    %323 = arith.addf %320, %322 : vector<2x32xf32>
    %cst_55 = arith.constant 0.000000e+00 : f32
    %324 = vector.broadcast %cst_55 : f32 to vector<2x32xf32>
    %325 = arith.maximumf %323, %324 : vector<2x32xf32>
    %326 = vector.extract_strided_slice %0 {offsets = [6, 0], sizes = [1, 32], strides = [1, 1]} : vector<16x96xf32> to vector<1x32xf32>
    %327 = vector.broadcast %326 : vector<1x32xf32> to vector<2x32xf32>
    %328 = arith.mulf %325, %327 : vector<2x32xf32>
    %cst_56 = arith.constant dense<0.000000e+00> : vector<2xf32>
    %329 = vector.multi_reduction <add>, %328, %cst_56 [1] : vector<2x32xf32> to vector<2xf32>
    %330 = vector.shape_cast %329 : vector<2xf32> to vector<2x1xf32>
    %331 = vector.extract_strided_slice %0 {offsets = [9, 0], sizes = [1, 1], strides = [1, 1]} : vector<16x96xf32> to vector<1x1xf32>
    %332 = vector.broadcast %331 : vector<1x1xf32> to vector<2x1xf32>
    %333 = arith.addf %330, %332 : vector<2x1xf32>
    %c0_57 = arith.constant 0 : index
    %c0_58 = arith.constant 0 : index
    %c0_59 = arith.constant 0 : index
    %334 = vector.load %arg1[%c0_57, %c0_58, %c0_59] : memref<2x10x32xf32, #tpu.memory_space<vmem>>, vector<2x10x32xf32>
    %335 = vector.shape_cast %334 : vector<2x10x32xf32> to vector<20x32xf32>
    %c0_60 = arith.constant 0 : index
    %c896 = arith.constant 896 : index
    %336 = vector.load %arg2[%c0_60, %c896] : memref<32x1024xf32, #tpu.memory_space<vmem>>, vector<32x32xf32>
    %cst_61 = arith.constant dense<0.000000e+00> : vector<20x32xf32>
    %337 = tpu.matmul %335, %336, %cst_61 {dimension_numbers = #tpu.dot_dimension_numbers<[1], [0], [0], [1], [0, 0, 1, 1], [], []>} : vector<20x32xf32>, vector<32x32xf32>, vector<20x32xf32> -> vector<20x32xf32>
    %338 = vector.shape_cast %337 : vector<20x32xf32> to vector<2x10x32xf32>
    %c0_62 = arith.constant 0 : index
    %c768 = arith.constant 768 : index
    %339 = vector.load %arg2[%c0_62, %c768] : memref<32x1024xf32, #tpu.memory_space<vmem>>, vector<32x32xf32>
    %cst_63 = arith.constant dense<0.000000e+00> : vector<2x32xf32>
    %340 = tpu.matmul %318, %339, %cst_63 {dimension_numbers = #tpu.dot_dimension_numbers<[1], [0], [0], [1], [0, 0, 1, 1], [], []>} : vector<2x32xf32>, vector<32x32xf32>, vector<2x32xf32> -> vector<2x32xf32>
    %341 = vector.shape_cast %340 : vector<2x32xf32> to vector<2x1x32xf32>
    %342 = vector.broadcast %341 : vector<2x1x32xf32> to vector<2x10x32xf32>
    %343 = arith.addf %342, %338 : vector<2x10x32xf32>
    %344 = vector.extract_strided_slice %0 {offsets = [7, 0], sizes = [1, 32], strides = [1, 1]} : vector<16x96xf32> to vector<1x32xf32>
    %345 = vector.shape_cast %344 : vector<1x32xf32> to vector<1x1x32xf32>
    %346 = vector.broadcast %345 : vector<1x1x32xf32> to vector<2x10x32xf32>
    %347 = arith.addf %343, %346 : vector<2x10x32xf32>
    %cst_64 = arith.constant 0.000000e+00 : f32
    %348 = vector.broadcast %cst_64 : f32 to vector<2x10x32xf32>
    %349 = arith.maximumf %347, %348 : vector<2x10x32xf32>
    %350 = vector.extract_strided_slice %0 {offsets = [8, 0], sizes = [1, 32], strides = [1, 1]} : vector<16x96xf32> to vector<1x32xf32>
    %351 = vector.shape_cast %350 : vector<1x32xf32> to vector<1x1x32xf32>
    %352 = vector.broadcast %351 : vector<1x1x32xf32> to vector<2x10x32xf32>
    %353 = arith.mulf %349, %352 : vector<2x10x32xf32>
    %cst_65 = arith.constant dense<0.000000e+00> : vector<2x10xf32>
    %354 = vector.multi_reduction <add>, %353, %cst_65 [2] : vector<2x10x32xf32> to vector<2x10xf32>
    %355 = vector.extract_strided_slice %0 {offsets = [10, 0], sizes = [1, 1], strides = [1, 1]} : vector<16x96xf32> to vector<1x1xf32>
    %356 = vector.broadcast %355 : vector<1x1xf32> to vector<2x10xf32>
    %357 = arith.addf %354, %356 : vector<2x10xf32>
    %358 = vector.broadcast %333 : vector<2x1xf32> to vector<2x10xf32>
    %359 = arith.addf %357, %358 : vector<2x10xf32>
    %cst_66 = arith.constant dense<0.000000e+00> : vector<2xf32>
    %360 = vector.multi_reduction <add>, %357, %cst_66 [1] : vector<2x10xf32> to vector<2xf32>
    %361 = vector.shape_cast %360 : vector<2xf32> to vector<2x1xf32>
    %cst_67 = arith.constant 1.000000e+01 : f32
    %362 = vector.broadcast %cst_67 : f32 to vector<2x1xf32>
    %363 = arith.divf %361, %362 : vector<2x1xf32>
    %364 = vector.broadcast %363 : vector<2x1xf32> to vector<2x10xf32>
    %365 = arith.subf %359, %364 : vector<2x10xf32>
    %c0_68 = arith.constant 0 : index
    %c0_69 = arith.constant 0 : index
    %366 = vector.load %arg4[%c0_68, %c0_69] : memref<2x10xf32, #tpu.memory_space<vmem>>, vector<2x10xf32>
    tpu.vector_store %arg4[%c0_68, %c0_69], %365 {strides = array<i32>} : memref<2x10xf32, #tpu.memory_space<vmem>>, vector<2x10xf32>,
    return
  }
}

</mosaic_0001>

<bundles_post_ra>
// kernel: qnet_forward_packed.1
= control target key start
LH: loop header
LB: loop body
LE: loop exit
PB: predicated region body
PF: predicated region fallthrough
CT: control target
= control target key end

     0   :  { %9 = vsyncpa [#allocation3], 0  ;;  %s4076_s0 = inlined_call_operand.vmem [shape: f32[2,8,32], index: 0, kind: input, shape index: {}]   ;;  %s4077_s1 = inlined_call_operand.vmem [shape: f32[2,10,32], index: 1, kind: input, shape index: {}]   ;;  %s4078_s2 = inlined_call_operand.hbm [shape: f32[32,1024], index: 2, kind: input, shape index: {}]   ;;  %s4079_s3 = inlined_call_operand.vmem [shape: f32[16,96], index: 3, kind: input, shape index: {}]   ;;  %s4080_s4 = inlined_call_operand.hbm [shape: f32[2,10], index: 4, kind: output, shape index: {}]  }
   0x1   :  { %10 = vsyncpa [#allocation4], 0  ;;  %s3388_s15 = smov [#allocation2]   ;;  %s3340_s19 = scalar_lea.hbm %s4078_s2, 4096 }
   0x2   :  { %s20_s16 = sshll.u32 %s3388_s15, 4  ;;  %p3341_p0 = scmp.ne.s32.totalorder %s4078_s2, %s3340_s19  ;;  %s21_s16 = int_to_ptr.vmem [resolvable:$true] %s20_s16 }
   0x3   :  { %p3344_p1 = scmp.lt.u32.totalorder %s3340_s19, %s4078_s2 }
   0x5   :  { %p3346_p2 = pnand %p3344_p1, %p3341_p0 }
   0x7   :  { %3349 = shalt.err (!%p3346_p2)
}
   0x8   :  { %s3350_s24 = scalar_lea.vmem %s21_s16, 4096  ;;  %p3355_p4 = scmp.lt.s32.totalorder %s21_s16, %s21_s16 }
   0x9   :  { %p3351_p3 = scmp.ne.s32.totalorder %s21_s16, %s3350_s24  ;;  %p3356_p5 = scmp.lt.s32.totalorder %s3350_s24, %s3350_s24 }
   0xb   :  { %p3357_p6 = por %p3356_p5, %p3355_p4 }
   0xd   :  { %p3358_p7 = pnand %p3357_p6, %p3351_p3 }
   0xf   :  { %3361 = shalt.err (!%p3358_p7)
}
  0x10   :  { %s3389_s25 = smov 1024   ;;  %s3390_s26 = smov 64  }
  0x11   :  { %26 = dma.hbm_to_vmem [thread:$0]  %s4078_s2, 4096, %s21_s16, [#allocation3], %s3389_s25, %s3389_s25, %s3390_s26  }
  0x12   :  { %3384 = dma.done.wait [#allocation3], 4096  }
  0x13   :  { %3385 = vsyncadd [#allocation3], 4294963200  ;;  %v3391_v0 = vmov 0.0|0.0   ;;  %vm3392_vm0 = vmmov 0   ;;  %v3393_v1 = vmov 0.0   ;;  %v36_v2 = vld [vmem:[#allocation2] sm:$0xff]  ;;  %v40_v16 = vlaneseq }
  0x14   :  { %3061 = vmatprep.subr.bf16.mxu1 %v3391_v0  ;;  %2901 = vmatprep.mubr.msk.f32.mxu1 %vm3392_vm0, %v3393_v1  ;;  %v37_v3 = vld [vmem:[#allocation2 + $0x40] sm:$0xff]  ;;  %v126_v4 = vld [vmem:[#allocation2 + $0x8] sm:$0xff]  ;;  %vm44_vm1 = vcmask 261120   ;;  %s3394_s7 = smov 96   ;;  %vm266_vm2 = vcmask 1041409   ;;  %vm1249_vm3 = vcmask 1043459  }
  0x15   :  { %v3053_v5 = vpack.c.bf16 %v37_v3, %v36_v2  ;;  %v127_v6 = vld [vmem:[#allocation2 + $0x48] sm:$0xff]  ;;  %v38_v7 = vld [vmem:[#allocation2 + $0x80] sm:$0xff]  ;;  %v3472_v17 = vshrl.u32 %v40_v16, 7  ;;  %vm1289_vm4 = vcmask 1041408   ;;  %vm1256_vm5 = vcmask 1045509   ;;  %s3399_s21 = smov [#allocation5]  }
  0x16   :  { %v39_v8 = vld [vmem:[#allocation2 + $0xc0] sm:$0xff]  ;;  %v3441_v9 = vpack.c.bf16 %v127_v6, %v126_v4  ;;  %v128_v11 = vld [vmem:[#allocation2 + $0x88] sm:$0xff]  ;;  %vm1291_vm6 = vcmask 1043456   ;;  %vm1263_vm7 = vcmask 1047559   ;;  %vm1293_vm8 = vcmask 1045504   ;;  %s2758_s22 = sshll.u32 %s3399_s21, 4  ;;  %s2759_s22 = int_to_ptr.vmem [resolvable:$true] %s2758_s22 }
  0x17   :  { %v3057_v10 = vpack.c.bf16 %v39_v8, %v38_v7  ;;  %v129_v12 = vld [vmem:[#allocation2 + $0xc8] sm:$0xff]  ;;  %v34_v13 = vld [vmem:[%s4076_s0] sm:$0xff]  ;;  %3054 = vmatprep.subr.bf16.mxu0 %v3053_v5  ;;  %v3475_v18 = vsub.s32 1, %v3472_v17  ;;  %v3487_v27 = vsub.s32 0, %v3472_v17  ;;  %vm1563_vm9 = vcmask 254976   ;;  %s3362_s23 = scalar_lea.vmem %s2759_s22, 32  ;;  %p3367_p9 = scmp.lt.s32.totalorder %s2759_s22, %s2759_s22 }
  0x18   :  { %2890 = vmatprep.mubr.msk.f32.mxu0 %vm44_vm1, %v34_v13  ;;  %3063 = vmatpush3.bf16.msra.mxu1 %v3441_v9  ;;  %v3448_v14 = vpack.c.bf16 %v129_v12, %v128_v11  ;;  %v35_v15 = vld [vmem:[%s4076_s0 + $0x8] sm:$0xff]  ;;  %v32_v19 = vld [vmem:[%s4079_s3] sm:$0xff]  ;;  %vm1740_vm10 = vcmask 7168   ;;  %vm1749_vm11 = vcmask 9216   ;;  %vm1934_vm12 = vcmask 779776   ;;  %p3363_p8 = scmp.ne.s32.totalorder %s2759_s22, %s3362_s23  ;;  %p3368_p10 = scmp.lt.s32.totalorder %s3362_s23, %s3362_s23 }
  0x19   :  { %3056 = vmatpush3.bf16.msra.mxu0 %v3053_v5  ;;  %3064 = vmatprep.subr.bf16.mxu1 %v3391_v0  ;;  %v3481_v20 = vrot.slane %v32_v19, %v3475_v18  ;;  %v43_v28 = vrot.slane %v32_v19, %v3487_v27  ;;  %vm2681_vm13 = vcmask 130112   ;;  %vm2694_vm14 = vcmask 74752  }
  0x1a   :  { %3058 = vmatprep.subr.bf16.mxu0 %v3057_v10  ;;  %p3369_p11 = por %p3368_p10, %p3367_p9 }
  0x1c   :  { %3066 = vmatpush3.bf16.msra.mxu1 %v3448_v14  ;;  %p3370_p12 = pnand %p3369_p11, %p3363_p8 }
  0x1d   :  { %3060 = vmatpush3.bf16.msra.mxu0 %v3057_v10  ;;  %3073 = vmatprep.subr.bf16.mxu1 %v3391_v0 }
  0x1e   :  { %3067 = vmatprep.subr.bf16.mxu0 %v3391_v0 }
  0x1f   :  { %2902 = vmatmul.mubr.f32.vlgmr.msra.gmra.mrb[0].mxu1 %v3393_v1 }
  0x20   :  { %2891 = vmatmul.mubr.msk.f32.vlgmr.msra.gmra.mrb[0].mxu0 %vm44_vm1, %v35_v15  ;;  %3075 = vmatpush3.bf16.msra.mxu1 %v3441_v9 }
  0x21   :  { %3069 = vmatpush3.bf16.msra.mxu0 %v3441_v9  ;;  %2912 = vmatprep.mubr.msk.f32.mxu0 %vm3392_vm0, %v3393_v1 }
  0x22   :  { %3070 = vmatprep.subr.bf16.mxu0 %v3391_v0  ;;  %3076 = vmatprep.subr.bf16.mxu1 %v3391_v0 }
  0x23   :  { %2923 = vmatprep.mubr.msk.f32.mxu1 %vm3392_vm0, %v3393_v1 }
  0x24   :  { %3078 = vmatpush3.bf16.msra.mxu1 %v3448_v14 }
  0x25   :  { %3072 = vmatpush3.bf16.msra.mxu0 %v3448_v14  ;;  %3085 = vmatprep.subr.bf16.mxu1 %v3391_v0 }
  0x26   :  { %3079 = vmatprep.subr.bf16.mxu0 %v3391_v0 }
  0xf2   :  { %v203_v21 = vpop.f32.mrb[0].mxu1 }
  0xf3   :  { %v2892_v22 = vpop.f32.mrb[0].mxu0  ;;  %v204_v23 = vadd.f32 %v203_v21, %v3481_v20  ;;  %v2903_v24 = vpop.f32.mrb[1].mxu1 }
  0xf4   :  { %v117_v25 = vpop.f32.mrb[1].mxu0  ;;  %v3490_v29 = vadd.f32 %v2892_v22, %v43_v28 }
  0xf5   :  { %v208_v26 = vrot.slane %v204_v23, 1  ;;  %v3492_v30 = vadd.f32 %v117_v25, %v43_v28 }
  0xf7   :  { %227 = vrot.lane.b32.xlu0 %v208_v26, %s3390_s26  ;;  %v212_v31 = vadd.f32 %v208_v26, %v3490_v29  ;;  %v211_v33 = vadd.f32 %v204_v23, %v3492_v30 }
  0xf9   :  { %v2770_v32 = vmul.f32 -1.442695, %v212_v31  ;;  %v2769_v34 = vmul.f32 -1.442695, %v211_v33 }
  0xfb   :  { %225 = vrot.lane.b32.xlu0 %v204_v23, %s3390_s26  ;;  %3178 = vpow2.f32 %v2770_v32 }
  0xfc   :  { %3180 = vpow2.f32 %v2769_v34 }
 0x105   :  { %v3179_v35 = vpop.eup %3178 }
 0x106   :  { %v220_v36 = vadd.f32 1.0, %v3179_v35  ;;  %v3181_v37 = vpop.eup %3180 }
 0x107   :  { %v219_v38 = vadd.f32 1.0, %v3181_v37 }
 0x108   :  { %3182 = vrcp.f32 %v220_v36 }
 0x109   :  { %3184 = vrcp.f32 %v219_v38 }
 0x112   :  { %v3183_v39 = vpop.eup %3182 }
 0x113   :  { %v3185_v42 = vpop.eup %3184  ;;  %v246_v51 = vsub.f32 1.0, %v3183_v39  ;;  %v258_v53 = vmul.f32 0.0, %v3183_v39 }
 0x114   :  { %v245_v56 = vsub.f32 1.0, %v3185_v42  ;;  %v257_v58 = vmul.f32 0.0, %v3185_v42 }
 0x169   :  { %v228_v40 = vpop.permute.xlu0 %227 }
 0x16a   :  { %v232_v41 = vmul.f32 %v3183_v39, %v228_v40 }
 0x16c   :  { %237 = vrot.lane.b32.xlu1 %v232_v41, %s3390_s26 }
 0x16d   :  { %v226_v43 = vpop.permute.xlu0 %225 }
 0x16e   :  { %v231_v44 = vmul.f32 %v3185_v42, %v226_v43 }
 0x170   :  { %235 = vrot.lane.b32.xlu1 %v231_v44, %s3390_s26 }
 0x1de   :  { %v238_v45 = vpop.permute.xlu1 %237 }
 0x1df   :  { %v242_v46 = vadd.f32 %v238_v45, %v3490_v29 }
 0x1e1   :  { %3186 = vtanh.f32 %v242_v46 }
 0x1e2   :  { %v236_v47 = vpop.permute.xlu1 %235 }
 0x1e3   :  { %v241_v48 = vadd.f32 %v236_v47, %v3492_v30 }
 0x1e5   :  { %3188 = vtanh.f32 %v241_v48 }
 0x1eb   :  { %v3187_v49 = vpop.eup %3186 }
 0x1ec   :  { %251 = vrot.lane.b32.xlu0 %v3187_v49, %s3394_s7 }
 0x1ef   :  { %v3189_v50 = vpop.eup %3188 }
 0x1f0   :  { %249 = vrot.lane.b32.xlu1 %v3189_v50, %s3394_s7 }
 0x25e   :  { %v252_v52 = vpop.permute.xlu0 %251 }
 0x25f   :  { %v256_v54 = vmul.f32 %v252_v52, %v246_v51 }
 0x261   :  { %v260_v55 = vadd.f32 %v258_v53, %v256_v54 }
 0x262   :  { %v250_v57 = vpop.permute.xlu1 %249 }
 0x263   :  { %3190 = vtanh.f32 %v260_v55  ;;  %v255_v59 = vmul.f32 %v250_v57, %v245_v56  ;;  %v265_v60 = vrot.slane %v260_v55, 7 }
 0x265   :  { %v259_v61 = vadd.f32 %v257_v58, %v255_v59 }
 0x267   :  { %3192 = vtanh.f32 %v259_v61  ;;  %v267_v62 = vsel %vm266_vm2, %v265_v60, %v259_v61  ;;  %v392_v44 = vrot.slane %v259_v61, 7 }
 0x268   :  { %268 = vrot.lane.b32.xlu0 %v267_v62, %s3394_s7 }
 0x26d   :  { %v3191_v63 = vpop.eup %3190 }
 0x26e   :  { %v1242_v2 = vrot.slane %v3191_v63, 7 }
 0x271   :  { %v3193_v3 = vpop.eup %3192 }
 0x272   :  { %v3505_v4 = vsel %vm266_vm2, %v1242_v2, %v3193_v3 }
 0x2da   :  { %v269_v5 = vpop.permute.xlu0 %268 }
 0x2db   :  { %2913 = vmatmul.mubr.msk.f32.vlgmr.msra.gmra.mrb[2].mxu0 %vm44_vm1, %v269_v5 }
 0x2dc   :  { %3081 = vmatpush3.bf16.msra.mxu0 %v3441_v9  ;;  %2934 = vmatprep.mubr.msk.f32.mxu0 %vm3392_vm0, %v3393_v1 }
 0x2dd   :  { %3082 = vmatprep.subr.bf16.mxu0 %v3391_v0 }
 0x2e0   :  { %3084 = vmatpush3.bf16.msra.mxu0 %v3448_v14 }
 0x2e1   :  { %3091 = vmatprep.subr.bf16.mxu0 %v3391_v0 }
 0x3ae   :  { %v338_v6 = vpop.f32.mrb[2].mxu0 }
 0x3af   :  { %v339_v7 = vadd.f32 %v338_v6, %v3481_v20  ;;  %v2914_v8 = vpop.f32.mrb[3].mxu0 }
 0x3b1   :  { %362 = vrot.lane.b32.xlu0 %v339_v7, %s3390_s26  ;;  %v343_v10 = vrot.slane %v339_v7, 7  ;;  %v347_v11 = vadd.f32 %v339_v7, %v3490_v29 }
 0x3b3   :  { %360 = vrot.lane.b32.xlu1 %v343_v10, %s3390_s26  ;;  %v346_v12 = vadd.f32 %v343_v10, %v3492_v30  ;;  %v2773_v13 = vmul.f32 -1.442695, %v347_v11 }
 0x3b5   :  { %v2772_v15 = vmul.f32 -1.442695, %v346_v12  ;;  %3194 = vpow2.f32 %v2773_v13 }
 0x3b7   :  { %3196 = vpow2.f32 %v2772_v15 }
 0x3bf   :  { %v3195_v19 = vpop.eup %3194 }
 0x3c0   :  { %v355_v22 = vadd.f32 1.0, %v3195_v19 }
 0x3c1   :  { %v3197_v21 = vpop.eup %3196 }
 0x3c2   :  { %v354_v23 = vadd.f32 1.0, %v3197_v21  ;;  %3198 = vrcp.f32 %v355_v22 }
 0x3c4   :  { %3200 = vrcp.f32 %v354_v23 }
 0x3cc   :  { %v3199_v24 = vpop.eup %3198 }
 0x3cd   :  { %v381_v39 = vsub.f32 1.0, %v3199_v24  ;;  %v396_v41 = vmul.f32 %v3199_v24, %v265_v60 }
 0x3ce   :  { %v3201_v28 = vpop.eup %3200 }
 0x3cf   :  { %v380_v43 = vsub.f32 1.0, %v3201_v28  ;;  %v395_v47 = vmul.f32 %v3201_v28, %v392_v44 }
 0x423   :  { %v363_v25 = vpop.permute.xlu0 %362 }
 0x424   :  { %v367_v26 = vmul.f32 %v3199_v24, %v363_v25 }
 0x425   :  { %v361_v31 = vpop.permute.xlu1 %360 }
 0x426   :  { %372 = vrot.lane.b32.xlu0 %v367_v26, %s3390_s26  ;;  %v366_v32 = vmul.f32 %v3201_v28, %v361_v31 }
 0x428   :  { %370 = vrot.lane.b32.xlu1 %v366_v32, %s3390_s26 }
 0x498   :  { %v373_v33 = vpop.permute.xlu0 %372 }
 0x499   :  { %v377_v34 = vadd.f32 %v373_v33, %v3490_v29 }
 0x49a   :  { %v371_v35 = vpop.permute.xlu1 %370 }
 0x49b   :  { %3202 = vtanh.f32 %v377_v34  ;;  %v376_v36 = vadd.f32 %v371_v35, %v3492_v30 }
 0x49d   :  { %3204 = vtanh.f32 %v376_v36 }
 0x4a5   :  { %v3203_v37 = vpop.eup %3202 }
 0x4a6   :  { %386 = vrot.lane.b32.xlu0 %v3203_v37, %s3394_s7 }
 0x4a7   :  { %v3205_v38 = vpop.eup %3204 }
 0x4a8   :  { %384 = vrot.lane.b32.xlu1 %v3205_v38, %s3394_s7 }
 0x518   :  { %v387_v40 = vpop.permute.xlu0 %386 }
 0x519   :  { %v391_v42 = vmul.f32 %v387_v40, %v381_v39 }
 0x51a   :  { %v385_v45 = vpop.permute.xlu1 %384 }
 0x51b   :  { %v3525_v46 = vadd.f32 %v396_v41, %v391_v42  ;;  %v390_v48 = vmul.f32 %v385_v45, %v380_v43 }
 0x51d   :  { %3206 = vtanh.f32 %v3525_v46  ;;  %v3528_v49 = vadd.f32 %v395_v47, %v390_v48  ;;  %v531_v32 = vrot.slane %v3525_v46, 7 }
 0x51f   :  { %3208 = vtanh.f32 %v3528_v49  ;;  %v403_v50 = vrot.slane %v3528_v49, 1  ;;  %v530_v35 = vrot.slane %v3528_v49, 7 }
 0x521   :  { %v404_v51 = vsel %vm266_vm2, %v3525_v46, %v403_v50 }
 0x522   :  { %405 = vrot.lane.b32.xlu1 %v404_v51, %s3394_s7 }
 0x527   :  { %v3207_v52 = vpop.eup %3206 }
 0x528   :  { %v1248_v54 = vrot.slane %v3207_v52, 6 }
 0x529   :  { %v3209_v53 = vpop.eup %3208 }
 0x52a   :  { %v1247_v55 = vrot.slane %v3209_v53, 7 }
 0x52c   :  { %v1250_v56 = vsel %vm1249_vm3, %v1248_v54, %v1247_v55 }
 0x52d   :  { %v3538_v57 = vsel %vm1289_vm4, %v3505_v4, %v1250_v56 }
 0x594   :  { %v406_v58 = vpop.permute.xlu1 %405 }
 0x595   :  { %2924 = vmatmul.mubr.msk.f32.vlgmr.msra.gmra.mrb[2].mxu1 %vm44_vm1, %v406_v58 }
 0x596   :  { %3087 = vmatpush3.bf16.msra.mxu1 %v3441_v9  ;;  %2945 = vmatprep.mubr.msk.f32.mxu1 %vm3392_vm0, %v3393_v1 }
 0x597   :  { %3088 = vmatprep.subr.bf16.mxu1 %v3391_v0 }
 0x59a   :  { %3090 = vmatpush3.bf16.msra.mxu1 %v3448_v14 }
 0x59b   :  { %3097 = vmatprep.subr.bf16.mxu1 %v3391_v0 }
 0x668   :  { %v475_v59 = vpop.f32.mrb[2].mxu1 }
 0x669   :  { %v476_v60 = vadd.f32 %v475_v59, %v3481_v20  ;;  %v2925_v61 = vpop.f32.mrb[3].mxu1 }
 0x66b   :  { %v481_v62 = vrot.slane %v476_v60, 7  ;;  %v480_v63 = vrot.slane %v476_v60, 6 }
 0x66d   :  { %500 = vrot.lane.b32.xlu1 %v481_v62, %s3390_s26  ;;  %498 = vrot.lane.b32.xlu0 %v480_v63, %s3390_s26  ;;  %v485_v2 = vadd.f32 %v481_v62, %v3490_v29  ;;  %v484_v3 = vadd.f32 %v480_v63, %v3492_v30 }
 0x66f   :  { %v2776_v4 = vmul.f32 -1.442695, %v485_v2  ;;  %v2775_v5 = vmul.f32 -1.442695, %v484_v3 }
 0x671   :  { %3210 = vpow2.f32 %v2776_v4 }
 0x672   :  { %3212 = vpow2.f32 %v2775_v5 }
 0x67b   :  { %v3211_v6 = vpop.eup %3210 }
 0x67c   :  { %v3213_v7 = vpop.eup %3212  ;;  %v493_v8 = vadd.f32 1.0, %v3211_v6 }
 0x67d   :  { %v492_v10 = vadd.f32 1.0, %v3213_v7 }
 0x67e   :  { %3214 = vrcp.f32 %v493_v8 }
 0x67f   :  { %3216 = vrcp.f32 %v492_v10 }
 0x688   :  { %v3215_v11 = vpop.eup %3214 }
 0x689   :  { %v3217_v12 = vpop.eup %3216  ;;  %v519_v31 = vsub.f32 1.0, %v3215_v11  ;;  %v535_v36 = vmul.f32 %v3215_v11, %v531_v32 }
 0x68a   :  { %v518_v34 = vsub.f32 1.0, %v3217_v12  ;;  %v534_v39 = vmul.f32 %v3217_v12, %v530_v35 }
 0x6df   :  { %v501_v13 = vpop.permute.xlu1 %500  ;;  %v499_v15 = vpop.permute.xlu0 %498 }
 0x6e0   :  { %v505_v19 = vmul.f32 %v3215_v11, %v501_v13  ;;  %v504_v21 = vmul.f32 %v3217_v12, %v499_v15 }
 0x6e2   :  { %510 = vrot.lane.b32.xlu1 %v505_v19, %s3390_s26  ;;  %508 = vrot.lane.b32.xlu0 %v504_v21, %s3390_s26 }
 0x754   :  { %v511_v22 = vpop.permute.xlu1 %510  ;;  %v509_v23 = vpop.permute.xlu0 %508 }
 0x755   :  { %v515_v24 = vadd.f32 %v511_v22, %v3490_v29  ;;  %v514_v25 = vadd.f32 %v509_v23, %v3492_v30 }
 0x757   :  { %3218 = vtanh.f32 %v515_v24 }
 0x758   :  { %3220 = vtanh.f32 %v514_v25 }
 0x761   :  { %v3219_v26 = vpop.eup %3218 }
 0x762   :  { %v3221_v28 = vpop.eup %3220  ;;  %524 = vrot.lane.b32.xlu1 %v3219_v26, %s3394_s7 }
 0x763   :  { %522 = vrot.lane.b32.xlu0 %v3221_v28, %s3394_s7 }
 0x7d4   :  { %v525_v33 = vpop.permute.xlu1 %524 }
 0x7d5   :  { %v529_v37 = vmul.f32 %v525_v33, %v519_v31  ;;  %v523_v38 = vpop.permute.xlu0 %522 }
 0x7d6   :  { %v528_v40 = vmul.f32 %v523_v38, %v518_v34 }
 0x7d7   :  { %v3560_v41 = vadd.f32 %v535_v36, %v529_v37 }
 0x7d8   :  { %v3562_v42 = vadd.f32 %v534_v39, %v528_v40 }
 0x7d9   :  { %3222 = vtanh.f32 %v3560_v41  ;;  %v543_v43 = vrot.slane %v3560_v41, 1  ;;  %v671_v23 = vrot.slane %v3560_v41, 7 }
 0x7da   :  { %3224 = vtanh.f32 %v3562_v42  ;;  %v542_v44 = vrot.slane %v3562_v42, 2  ;;  %v670_v26 = vrot.slane %v3562_v42, 7 }
 0x7dc   :  { %v544_v45 = vsel %vm266_vm2, %v543_v43, %v542_v44 }
 0x7dd   :  { %545 = vrot.lane.b32.xlu0 %v544_v45, %s3394_s7 }
 0x7e3   :  { %v3223_v46 = vpop.eup %3222 }
 0x7e4   :  { %v3225_v47 = vpop.eup %3224  ;;  %v1255_v48 = vrot.slane %v3223_v46, 5 }
 0x7e5   :  { %v1254_v49 = vrot.slane %v3225_v47, 6 }
 0x7e7   :  { %v1257_v50 = vsel %vm1256_vm5, %v1255_v48, %v1254_v49 }
 0x7e8   :  { %v3573_v51 = vsel %vm1291_vm6, %v3538_v57, %v1257_v50 }
 0x84f   :  { %v546_v52 = vpop.permute.xlu0 %545 }
 0x850   :  { %2935 = vmatmul.mubr.msk.f32.vlgmr.msra.gmra.mrb[4].mxu0 %vm44_vm1, %v546_v52 }
 0x851   :  { %3093 = vmatpush3.bf16.msra.mxu0 %v3441_v9  ;;  %2956 = vmatprep.mubr.msk.f32.mxu0 %vm3392_vm0, %v3393_v1 }
 0x852   :  { %3094 = vmatprep.subr.bf16.mxu0 %v3391_v0 }
 0x855   :  { %3096 = vmatpush3.bf16.msra.mxu0 %v3448_v14 }
 0x856   :  { %3103 = vmatprep.subr.bf16.mxu0 %v3391_v0 }
 0x923   :  { %v615_v53 = vpop.f32.mrb[4].mxu0 }
 0x924   :  { %v616_v54 = vadd.f32 %v615_v53, %v3481_v20  ;;  %v2936_v55 = vpop.f32.mrb[5].mxu0 }
 0x926   :  { %v621_v56 = vrot.slane %v616_v54, 6  ;;  %v620_v57 = vrot.slane %v616_v54, 5 }
 0x928   :  { %640 = vrot.lane.b32.xlu0 %v621_v56, %s3390_s26  ;;  %638 = vrot.lane.b32.xlu1 %v620_v57, %s3390_s26  ;;  %v625_v58 = vadd.f32 %v621_v56, %v3490_v29  ;;  %v624_v59 = vadd.f32 %v620_v57, %v3492_v30 }
 0x92a   :  { %v2779_v60 = vmul.f32 -1.442695, %v625_v58  ;;  %v2778_v61 = vmul.f32 -1.442695, %v624_v59 }
 0x92c   :  { %3226 = vpow2.f32 %v2779_v60 }
 0x92d   :  { %3228 = vpow2.f32 %v2778_v61 }
 0x936   :  { %v3227_v62 = vpop.eup %3226 }
 0x937   :  { %v3229_v63 = vpop.eup %3228  ;;  %v633_v2 = vadd.f32 1.0, %v3227_v62 }
 0x938   :  { %v632_v3 = vadd.f32 1.0, %v3229_v63 }
 0x939   :  { %3230 = vrcp.f32 %v633_v2 }
 0x93a   :  { %3232 = vrcp.f32 %v632_v3 }
 0x943   :  { %v3231_v4 = vpop.eup %3230 }
 0x944   :  { %v3233_v5 = vpop.eup %3232  ;;  %v659_v22 = vsub.f32 1.0, %v3231_v4  ;;  %v675_v28 = vmul.f32 %v3231_v4, %v671_v23 }
 0x945   :  { %v658_v25 = vsub.f32 1.0, %v3233_v5  ;;  %v674_v33 = vmul.f32 %v3233_v5, %v670_v26 }
 0x99a   :  { %v641_v6 = vpop.permute.xlu0 %640  ;;  %v639_v7 = vpop.permute.xlu1 %638 }
 0x99b   :  { %v645_v8 = vmul.f32 %v3231_v4, %v641_v6  ;;  %v644_v10 = vmul.f32 %v3233_v5, %v639_v7 }
 0x99d   :  { %650 = vrot.lane.b32.xlu0 %v645_v8, %s3390_s26  ;;  %648 = vrot.lane.b32.xlu1 %v644_v10, %s3390_s26 }
 0xa0f   :  { %v651_v11 = vpop.permute.xlu0 %650  ;;  %v649_v12 = vpop.permute.xlu1 %648 }
 0xa10   :  { %v655_v13 = vadd.f32 %v651_v11, %v3490_v29  ;;  %v654_v15 = vadd.f32 %v649_v12, %v3492_v30 }
 0xa12   :  { %3234 = vtanh.f32 %v655_v13 }
 0xa13   :  { %3236 = vtanh.f32 %v654_v15 }
 0xa1c   :  { %v3235_v19 = vpop.eup %3234 }
 0xa1d   :  { %v3237_v21 = vpop.eup %3236  ;;  %664 = vrot.lane.b32.xlu0 %v3235_v19, %s3394_s7 }
 0xa1e   :  { %662 = vrot.lane.b32.xlu1 %v3237_v21, %s3394_s7 }
 0xa8f   :  { %v665_v24 = vpop.permute.xlu0 %664 }
 0xa90   :  { %v669_v31 = vmul.f32 %v665_v24, %v659_v22  ;;  %v663_v32 = vpop.permute.xlu1 %662 }
 0xa91   :  { %v668_v34 = vmul.f32 %v663_v32, %v658_v25 }
 0xa92   :  { %v3595_v35 = vadd.f32 %v675_v28, %v669_v31 }
 0xa93   :  { %v3597_v36 = vadd.f32 %v674_v33, %v668_v34 }
 0xa94   :  { %3238 = vtanh.f32 %v3595_v35  ;;  %v683_v37 = vrot.slane %v3595_v35, 2  ;;  %v811_v11 = vrot.slane %v3595_v35, 7 }
 0xa95   :  { %3240 = vtanh.f32 %v3597_v36  ;;  %v682_v38 = vrot.slane %v3597_v36, 3  ;;  %v810_v19 = vrot.slane %v3597_v36, 7 }
 0xa97   :  { %v684_v39 = vsel %vm266_vm2, %v683_v37, %v682_v38 }
 0xa98   :  { %685 = vrot.lane.b32.xlu1 %v684_v39, %s3394_s7 }
 0xa9e   :  { %v3239_v40 = vpop.eup %3238 }
 0xa9f   :  { %v3241_v41 = vpop.eup %3240  ;;  %v1262_v42 = vrot.slane %v3239_v40, 4 }
 0xaa0   :  { %v1261_v43 = vrot.slane %v3241_v41, 5 }
 0xaa2   :  { %v1264_v44 = vsel %vm1263_vm7, %v1262_v42, %v1261_v43 }
 0xaa3   :  { %v3608_v45 = vsel %vm1293_vm8, %v3573_v51, %v1264_v44 }
 0xb0a   :  { %v686_v46 = vpop.permute.xlu1 %685 }
 0xb0b   :  { %2946 = vmatmul.mubr.msk.f32.vlgmr.msra.gmra.mrb[4].mxu1 %vm44_vm1, %v686_v46 }
 0xb0c   :  { %3099 = vmatpush3.bf16.msra.mxu1 %v3441_v9  ;;  %2967 = vmatprep.mubr.msk.f32.mxu1 %vm3392_vm0, %v3393_v1 }
 0xb0d   :  { %3100 = vmatprep.subr.bf16.mxu1 %v3391_v0 }
 0xb10   :  { %3102 = vmatpush3.bf16.msra.mxu1 %v3448_v14 }
 0xbde   :  { %v755_v47 = vpop.f32.mrb[4].mxu1 }
 0xbdf   :  { %v756_v48 = vadd.f32 %v755_v47, %v3481_v20  ;;  %v2947_v49 = vpop.f32.mrb[5].mxu1 }
 0xbe1   :  { %v761_v50 = vrot.slane %v756_v48, 5  ;;  %v760_v52 = vrot.slane %v756_v48, 4 }
 0xbe3   :  { %780 = vrot.lane.b32.xlu1 %v761_v50, %s3390_s26  ;;  %778 = vrot.lane.b32.xlu0 %v760_v52, %s3390_s26  ;;  %v765_v51 = vadd.f32 %v761_v50, %v3490_v29  ;;  %v764_v53 = vadd.f32 %v760_v52, %v3492_v30 }
 0xbe5   :  { %v2782_v54 = vmul.f32 -1.442695, %v765_v51  ;;  %v2781_v55 = vmul.f32 -1.442695, %v764_v53 }
 0xbe7   :  { %3242 = vpow2.f32 %v2782_v54 }
 0xbe8   :  { %3244 = vpow2.f32 %v2781_v55 }
 0xbf1   :  { %v3243_v56 = vpop.eup %3242 }
 0xbf2   :  { %v3245_v57 = vpop.eup %3244  ;;  %v773_v58 = vadd.f32 1.0, %v3243_v56 }
 0xbf3   :  { %v772_v59 = vadd.f32 1.0, %v3245_v57 }
 0xbf4   :  { %3246 = vrcp.f32 %v773_v58 }
 0xbf5   :  { %3248 = vrcp.f32 %v772_v59 }
 0xbfe   :  { %v3247_v60 = vpop.eup %3246 }
 0xbff   :  { %v3249_v61 = vpop.eup %3248  ;;  %v799_v12 = vsub.f32 1.0, %v3247_v60  ;;  %v815_v21 = vmul.f32 %v3247_v60, %v811_v11 }
 0xc00   :  { %v798_v15 = vsub.f32 1.0, %v3249_v61  ;;  %v814_v24 = vmul.f32 %v3249_v61, %v810_v19 }
 0xc55   :  { %v781_v62 = vpop.permute.xlu1 %780  ;;  %v779_v63 = vpop.permute.xlu0 %778 }
 0xc56   :  { %v784_v2 = vmul.f32 %v3249_v61, %v779_v63  ;;  %v785_v3 = vmul.f32 %v3247_v60, %v781_v62 }
 0xc58   :  { %790 = vrot.lane.b32.xlu1 %v785_v3, %s3390_s26  ;;  %788 = vrot.lane.b32.xlu0 %v784_v2, %s3390_s26 }
 0xcca   :  { %v791_v4 = vpop.permute.xlu1 %790  ;;  %v789_v5 = vpop.permute.xlu0 %788 }
 0xccb   :  { %v795_v6 = vadd.f32 %v791_v4, %v3490_v29  ;;  %v794_v7 = vadd.f32 %v789_v5, %v3492_v30 }
 0xccd   :  { %3250 = vtanh.f32 %v795_v6 }
 0xcce   :  { %3252 = vtanh.f32 %v794_v7 }
 0xcd7   :  { %v3251_v8 = vpop.eup %3250 }
 0xcd8   :  { %v3253_v10 = vpop.eup %3252  ;;  %804 = vrot.lane.b32.xlu1 %v3251_v8, %s3394_s7 }
 0xcd9   :  { %802 = vrot.lane.b32.xlu0 %v3253_v10, %s3394_s7 }
 0xd4a   :  { %v805_v13 = vpop.permute.xlu1 %804 }
 0xd4b   :  { %v809_v22 = vmul.f32 %v805_v13, %v799_v12  ;;  %v803_v23 = vpop.permute.xlu0 %802 }
 0xd4c   :  { %v808_v25 = vmul.f32 %v803_v23, %v798_v15 }
 0xd4d   :  { %v3629_v26 = vadd.f32 %v815_v21, %v809_v22 }
 0xd4e   :  { %v3631_v28 = vadd.f32 %v814_v24, %v808_v25 }
 0xd4f   :  { %3254 = vtanh.f32 %v3629_v26  ;;  %v823_v31 = vrot.slane %v3629_v26, 3  ;;  %v951_v3 = vrot.slane %v3629_v26, 7 }
 0xd50   :  { %3256 = vtanh.f32 %v3631_v28  ;;  %v822_v32 = vrot.slane %v3631_v28, 4  ;;  %v950_v4 = vrot.slane %v3631_v28, 7 }
 0xd52   :  { %v824_v33 = vsel %vm266_vm2, %v823_v31, %v822_v32 }
 0xd53   :  { %825 = vrot.lane.b32.xlu0 %v824_v33, %s3394_s7 }
 0xd59   :  { %v3255_v34 = vpop.eup %3254 }
 0xd5a   :  { %v3257_v35 = vpop.eup %3256  ;;  %v1269_v36 = vrot.slane %v3255_v34, 3 }
 0xd5b   :  { %v1268_v37 = vrot.slane %v3257_v35, 4 }
 0xd5d   :  { %v3640_v38 = vsel %vm266_vm2, %v1269_v36, %v1268_v37 }
 0xdc5   :  { %v826_v39 = vpop.permute.xlu0 %825 }
 0xdc6   :  { %2957 = vmatmul.mubr.msk.f32.vlgmr.msra.gmra.mrb[6].mxu0 %vm44_vm1, %v826_v39 }
 0xdc7   :  { %3105 = vmatpush3.bf16.msra.mxu0 %v3441_v9  ;;  %2978 = vmatprep.mubr.msk.f32.mxu0 %vm3392_vm0, %v3393_v1 }
 0xdc8   :  { %3106 = vmatprep.subr.bf16.mxu0 %v3391_v0 }
 0xdcb   :  { %3108 = vmatpush3.bf16.msra.mxu0 %v3448_v14 }
 0xdcc   :  { %3117 = vmatprep.subr.bf16.mxu0 %v3391_v0 }
 0xe99   :  { %v895_v40 = vpop.f32.mrb[6].mxu0 }
 0xe9a   :  { %v896_v41 = vadd.f32 %v895_v40, %v3481_v20  ;;  %v2958_v42 = vpop.f32.mrb[7].mxu0 }
 0xe9c   :  { %v901_v43 = vrot.slane %v896_v41, 4  ;;  %v900_v44 = vrot.slane %v896_v41, 3 }
 0xe9e   :  { %920 = vrot.lane.b32.xlu0 %v901_v43, %s3390_s26  ;;  %918 = vrot.lane.b32.xlu1 %v900_v44, %s3390_s26  ;;  %v905_v9 = vadd.f32 %v901_v43, %v3490_v29  ;;  %v904_v46 = vadd.f32 %v900_v44, %v3492_v30 }
 0xea0   :  { %v2785_v47 = vmul.f32 -1.442695, %v905_v9  ;;  %v2784_v48 = vmul.f32 -1.442695, %v904_v46 }
 0xea2   :  { %3258 = vpow2.f32 %v2785_v47 }
 0xea3   :  { %3260 = vpow2.f32 %v2784_v48 }
 0xeac   :  { %v3259_v14 = vpop.eup %3258 }
 0xead   :  { %v3261_v49 = vpop.eup %3260  ;;  %v913_v50 = vadd.f32 1.0, %v3259_v14 }
 0xeae   :  { %v912_v52 = vadd.f32 1.0, %v3261_v49 }
 0xeaf   :  { %3262 = vrcp.f32 %v913_v50 }
 0xeb0   :  { %3264 = vrcp.f32 %v912_v52 }
 0xeb9   :  { %v3263_v51 = vpop.eup %3262 }
 0xeba   :  { %v3265_v53 = vpop.eup %3264  ;;  %v939_v2 = vsub.f32 1.0, %v3263_v51  ;;  %v955_v7 = vmul.f32 %v3263_v51, %v951_v3 }
 0xebb   :  { %v938_v6 = vsub.f32 1.0, %v3265_v53  ;;  %v954_v11 = vmul.f32 %v3265_v53, %v950_v4 }
 0xf10   :  { %v921_v54 = vpop.permute.xlu0 %920  ;;  %v919_v55 = vpop.permute.xlu1 %918 }
 0xf11   :  { %v925_v56 = vmul.f32 %v3263_v51, %v921_v54  ;;  %v924_v57 = vmul.f32 %v3265_v53, %v919_v55 }
 0xf13   :  { %930 = vrot.lane.b32.xlu0 %v925_v56, %s3390_s26  ;;  %928 = vrot.lane.b32.xlu1 %v924_v57, %s3390_s26 }
 0xf85   :  { %v931_v58 = vpop.permute.xlu0 %930  ;;  %v929_v59 = vpop.permute.xlu1 %928 }
 0xf86   :  { %v935_v60 = vadd.f32 %v931_v58, %v3490_v29  ;;  %v934_v61 = vadd.f32 %v929_v59, %v3492_v30 }
 0xf88   :  { %3266 = vtanh.f32 %v935_v60 }
 0xf89   :  { %3268 = vtanh.f32 %v934_v61 }
 0xf92   :  { %v3267_v62 = vpop.eup %3266 }
 0xf93   :  { %v3269_v63 = vpop.eup %3268  ;;  %944 = vrot.lane.b32.xlu0 %v3267_v62, %s3394_s7 }
 0xf94   :  { %942 = vrot.lane.b32.xlu1 %v3269_v63, %s3394_s7 }
0x1005   :  { %v945_v5 = vpop.permute.xlu0 %944 }
0x1006   :  { %v949_v8 = vmul.f32 %v945_v5, %v939_v2  ;;  %v943_v10 = vpop.permute.xlu1 %942 }
0x1007   :  { %v948_v12 = vmul.f32 %v943_v10, %v938_v6 }
0x1008   :  { %v957_v13 = vadd.f32 %v955_v7, %v949_v8 }
0x1009   :  { %v956_v15 = vadd.f32 %v954_v11, %v948_v12 }
0x100a   :  { %3270 = vtanh.f32 %v957_v13  ;;  %v963_v19 = vrot.slane %v957_v13, 4  ;;  %v1091_v58 = vrot.slane %v957_v13, 7 }
0x100b   :  { %3272 = vtanh.f32 %v956_v15  ;;  %v962_v21 = vrot.slane %v956_v15, 5  ;;  %v1090_v61 = vrot.slane %v956_v15, 7 }
0x100d   :  { %v964_v22 = vsel %vm266_vm2, %v963_v19, %v962_v21 }
0x100e   :  { %965 = vrot.lane.b32.xlu1 %v964_v22, %s3394_s7 }
0x1014   :  { %v3271_v23 = vpop.eup %3270 }
0x1015   :  { %v3273_v24 = vpop.eup %3272  ;;  %v1275_v25 = vrot.slane %v3271_v23, 2 }
0x1016   :  { %v1274_v26 = vrot.slane %v3273_v24, 3 }
0x1018   :  { %v1276_v28 = vsel %vm1249_vm3, %v1275_v25, %v1274_v26 }
0x1019   :  { %v3667_v31 = vsel %vm1289_vm4, %v3640_v38, %v1276_v28 }
0x1080   :  { %v966_v32 = vpop.permute.xlu1 %965 }
0x1081   :  { %2968 = vmatmul.mubr.msk.f32.vlgmr.msra.gmra.mrb[6].mxu1 %vm44_vm1, %v966_v32 }
0x1154   :  { %v1035_v33 = vpop.f32.mrb[6].mxu1 }
0x1155   :  { %v1036_v34 = vadd.f32 %v1035_v33, %v3481_v20  ;;  %v2969_v35 = vpop.f32.mrb[7].mxu1 }
0x1157   :  { %v1041_v36 = vrot.slane %v1036_v34, 3  ;;  %v1040_v37 = vrot.slane %v1036_v34, 2 }
0x1159   :  { %1060 = vrot.lane.b32.xlu1 %v1041_v36, %s3390_s26  ;;  %1058 = vrot.lane.b32.xlu0 %v1040_v37, %s3390_s26  ;;  %v1045_v39 = vadd.f32 %v1041_v36, %v3490_v29  ;;  %v1044_v40 = vadd.f32 %v1040_v37, %v3492_v30 }
0x115b   :  { %v2788_v41 = vmul.f32 -1.442695, %v1045_v39  ;;  %v2787_v38 = vmul.f32 -1.442695, %v1044_v40 }
0x115d   :  { %3274 = vpow2.f32 %v2788_v41 }
0x115e   :  { %3276 = vpow2.f32 %v2787_v38 }
0x1167   :  { %v3275_v42 = vpop.eup %3274 }
0x1168   :  { %v3277_v43 = vpop.eup %3276  ;;  %v1053_v44 = vadd.f32 1.0, %v3275_v42 }
0x1169   :  { %v1052_v9 = vadd.f32 1.0, %v3277_v43 }
0x116a   :  { %3278 = vrcp.f32 %v1053_v44 }
0x116b   :  { %3280 = vrcp.f32 %v1052_v9 }
0x1174   :  { %v3279_v46 = vpop.eup %3278 }
0x1175   :  { %v3281_v47 = vpop.eup %3280  ;;  %v1079_v57 = vsub.f32 1.0, %v3279_v46  ;;  %v1095_v62 = vmul.f32 %v3279_v46, %v1091_v58 }
0x1176   :  { %v1078_v60 = vsub.f32 1.0, %v3281_v47  ;;  %v1094_v3 = vmul.f32 %v3281_v47, %v1090_v61 }
0x11cb   :  { %v1061_v48 = vpop.permute.xlu1 %1060  ;;  %v1059_v14 = vpop.permute.xlu0 %1058 }
0x11cc   :  { %v1064_v49 = vmul.f32 %v3281_v47, %v1059_v14  ;;  %v1065_v50 = vmul.f32 %v3279_v46, %v1061_v48 }
0x11ce   :  { %1070 = vrot.lane.b32.xlu1 %v1065_v50, %s3390_s26  ;;  %1068 = vrot.lane.b32.xlu0 %v1064_v49, %s3390_s26  ;;  %v1298_v49 = vld [vmem:[#allocation2 + $0x10] sm:$0xff] }
0x11cf   :  { %v1299_v50 = vld [vmem:[#allocation2 + $0x50] sm:$0xff] }
0x1240   :  { %v1071_v52 = vpop.permute.xlu1 %1070  ;;  %v1069_v51 = vpop.permute.xlu0 %1068 }
0x1241   :  { %v1075_v53 = vadd.f32 %v1071_v52, %v3490_v29  ;;  %v1074_v54 = vadd.f32 %v1069_v51, %v3492_v30  ;;  %v1300_v52 = vld [vmem:[#allocation2 + $0x90] sm:$0xff]  ;;  %v3109_v51 = vpack.c.bf16 %v1299_v50, %v1298_v49 }
0x1243   :  { %3282 = vtanh.f32 %v1075_v53  ;;  %v1301_v53 = vld [vmem:[#allocation2 + $0xd0] sm:$0xff]  ;;  %3110 = vmatprep.subr.bf16.mxu1 %v3109_v51 }
0x1244   :  { %3284 = vtanh.f32 %v1074_v54  ;;  %v3113_v54 = vpack.c.bf16 %v1301_v53, %v1300_v52  ;;  %3112 = vmatpush3.bf16.msra.mxu1 %v3109_v51 }
0x1246   :  { %3114 = vmatprep.subr.bf16.mxu1 %v3113_v54 }
0x1248   :  { %3116 = vmatpush3.bf16.msra.mxu1 %v3113_v54 }
0x1249   :  { %3123 = vmatprep.subr.bf16.mxu1 %v3391_v0 }
0x124d   :  { %v3283_v55 = vpop.eup %3282 }
0x124e   :  { %v3285_v56 = vpop.eup %3284  ;;  %1084 = vrot.lane.b32.xlu1 %v3283_v55, %s3394_s7 }
0x124f   :  { %1082 = vrot.lane.b32.xlu0 %v3285_v56, %s3394_s7 }
0x12c0   :  { %v1085_v59 = vpop.permute.xlu1 %1084 }
0x12c1   :  { %v1089_v63 = vmul.f32 %v1085_v59, %v1079_v57  ;;  %v1083_v2 = vpop.permute.xlu0 %1082 }
0x12c2   :  { %v1088_v4 = vmul.f32 %v1083_v2, %v1078_v60 }
0x12c3   :  { %v3681_v5 = vadd.f32 %v1095_v62, %v1089_v63 }
0x12c4   :  { %v3683_v6 = vadd.f32 %v1094_v3, %v1088_v4 }
0x12c5   :  { %3286 = vtanh.f32 %v3681_v5  ;;  %v1103_v7 = vrot.slane %v3681_v5, 5 }
0x12c6   :  { %3288 = vtanh.f32 %v3683_v6  ;;  %v1102_v8 = vrot.slane %v3683_v6, 6  ;;  %v1230_v57 = vrot.slane %v3683_v6, 7 }
0x12c8   :  { %v1104_v10 = vsel %vm266_vm2, %v1103_v7, %v1102_v8 }
0x12c9   :  { %1105 = vrot.lane.b32.xlu0 %v1104_v10, %s3394_s7  ;;  %v3395_v10 = vmov 1983009808  }
0x12cf   :  { %v3287_v11 = vpop.eup %3286 }
0x12d0   :  { %v3289_v12 = vpop.eup %3288  ;;  %v1281_v13 = vrot.slane %v3287_v11, 1  ;;  %v1395_v11 = vunpack.c.l.s4 %v3395_v10 }
0x12d1   :  { %v1280_v15 = vrot.slane %v3289_v12, 2  ;;  %v1304_v12 = vsub.s32 2, %v3472_v17 }
0x12d3   :  { %v1282_v19 = vsel %vm1256_vm5, %v1281_v13, %v1280_v15  ;;  %v1396_v13 = vunpack.c.0.s8 %v1395_v11  ;;  %v3727_v15 = vld [vmem:[%s4079_s3] sm:$0xff] }
0x12d4   :  { %v3694_v21 = vsel %vm1291_vm6, %v3667_v31, %v1282_v19  ;;  %v1305_v19 = vrot.slane %v3727_v15, %v1304_v12 }
0x133b   :  { %v1106_v22 = vpop.permute.xlu0 %1105 }
0x133c   :  { %2979 = vmatmul.mubr.msk.f32.vlgmr.msra.gmra.mrb[8].mxu0 %vm44_vm1, %v1106_v22 }
0x133d   :  { %3000 = vmatprep.mubr.msk.f32.mxu0 %vm3392_vm0, %v3393_v1 }
0x140f   :  { %v1175_v23 = vpop.f32.mrb[8].mxu0 }
0x1410   :  { %v1176_v24 = vadd.f32 %v1175_v23, %v3481_v20  ;;  %v2980_v25 = vpop.f32.mrb[9].mxu0 }
0x1412   :  { %v1181_v26 = vrot.slane %v1176_v24, 2  ;;  %v1180_v28 = vrot.slane %v1176_v24, 1 }
0x1414   :  { %1200 = vrot.lane.b32.xlu0 %v1181_v26, %s3390_s26  ;;  %1198 = vrot.lane.b32.xlu1 %v1180_v28, %s3390_s26  ;;  %v1185_v32 = vadd.f32 %v1181_v26, %v3490_v29  ;;  %v1184_v31 = vadd.f32 %v1180_v28, %v3492_v30 }
0x1416   :  { %v2791_v33 = vmul.f32 -1.442695, %v1185_v32  ;;  %v2790_v34 = vmul.f32 -1.442695, %v1184_v31 }
0x1418   :  { %3290 = vpow2.f32 %v2791_v33 }
0x1419   :  { %3292 = vpow2.f32 %v2790_v34 }
0x1422   :  { %v3291_v35 = vpop.eup %3290 }
0x1423   :  { %v3293_v36 = vpop.eup %3292  ;;  %v1193_v37 = vadd.f32 1.0, %v3291_v35 }
0x1424   :  { %v1192_v39 = vadd.f32 1.0, %v3293_v36 }
0x1425   :  { %3294 = vrcp.f32 %v1193_v37 }
0x1426   :  { %3296 = vrcp.f32 %v1192_v39 }
0x142f   :  { %v3295_v20 = vpop.eup %3294 }
0x1430   :  { %v3297_v40 = vpop.eup %3296 }
0x1431   :  { %v1218_v56 = vsub.f32 1.0, %v3297_v40  ;;  %v1234_v60 = vmul.f32 %v3297_v40, %v1230_v57 }
0x1486   :  { %v1201_v41 = vpop.permute.xlu0 %1200  ;;  %v1199_v38 = vpop.permute.xlu1 %1198 }
0x1487   :  { %v1205_v42 = vmul.f32 %v3295_v20, %v1201_v41  ;;  %v1204_v43 = vmul.f32 %v3297_v40, %v1199_v38 }
0x1489   :  { %1210 = vrot.lane.b32.xlu0 %v1205_v42, %s3390_s26  ;;  %1208 = vrot.lane.b32.xlu1 %v1204_v43, %s3390_s26 }
0x14fb   :  { %v1211_v44 = vpop.permute.xlu0 %1210  ;;  %v1209_v9 = vpop.permute.xlu1 %1208 }
0x14fc   :  { %v1215_v46 = vadd.f32 %v1211_v44, %v3490_v29  ;;  %v1214_v47 = vadd.f32 %v1209_v9, %v3492_v30  ;;  %v1219_v29 = vsub.f32 1.0, %v3295_v20  ;;  %v1231_v30 = vrot.slane %v3681_v5, 7 }
0x14fe   :  { %3298 = vtanh.f32 %v1215_v46  ;;  %v1235_v59 = vmul.f32 %v3295_v20, %v1231_v30 }
0x14ff   :  { %3300 = vtanh.f32 %v1214_v47 }
0x1508   :  { %v3299_v48 = vpop.eup %3298 }
0x1509   :  { %v3301_v14 = vpop.eup %3300  ;;  %1224 = vrot.lane.b32.xlu0 %v3299_v48, %s3394_s7 }
0x150a   :  { %1222 = vrot.lane.b32.xlu1 %v3301_v14, %s3394_s7 }
0x150e   :  { %1308 = vrot.lane.b32.xlu1 %v3608_v45, %s3394_s7 }
0x157b   :  { %v1225_v55 = vpop.permute.xlu0 %1224 }
0x157c   :  { %v1229_v45 = vmul.f32 %v1225_v55, %v1219_v29  ;;  %v1223_v58 = vpop.permute.xlu1 %1222 }
0x157d   :  { %v1228_v61 = vmul.f32 %v1223_v58, %v1218_v56 }
0x157e   :  { %v1237_v62 = vadd.f32 %v1235_v59, %v1229_v45 }
0x157f   :  { %v1236_v63 = vadd.f32 %v1234_v60, %v1228_v61 }
0x1580   :  { %v1309_v2 = vpop.permute.xlu1 %1308 }
0x1581   :  { %3302 = vtanh.f32 %v1236_v63  ;;  %2989 = vmatprep.mubr.msk.f32.mxu1 %vm44_vm1, %v1309_v2 }
0x1582   :  { %3304 = vtanh.f32 %v1237_v62 }
0x158b   :  { %v3303_v3 = vpop.eup %3302 }
0x158c   :  { %v1286_v4 = vrot.slane %v3303_v3, 1  ;;  %v3305_v7 = vpop.eup %3304 }
0x158e   :  { %v1287_v5 = vsel %vm1263_vm7, %v3305_v7, %v1286_v4 }
0x158f   :  { %v1297_v6 = vsel %vm1293_vm8, %v3694_v21, %v1287_v5  ;;  %v3731_v21 = vsub.s32 %v1396_v13, %v3472_v17 }
0x1590   :  { %1310 = vrot.lane.b32.xlu0 %v1297_v6, %s3394_s7 }
0x1602   :  { %v1311_v8 = vpop.permute.xlu0 %1310 }
0x1603   :  { %2990 = vmatmul.mubr.msk.f32.vlgmr.msra.gmra.mrb[8].mxu1 %vm44_vm1, %v1311_v8 }
0x1604   :  { %3011 = vmatprep.mubr.msk.f32.mxu1 %vm3392_vm0, %v3393_v1 }
0x16d6   :  { %v2991_v22 = vpop.f32.mrb[8].mxu1 }
0x16d7   :  { %v1388_v23 = vadd.f32 %v2991_v22, %v1305_v19  ;;  %v1382_v24 = vpop.f32.mrb[9].mxu1 }
0x16d8   :  { %v1383_v25 = vadd.f32 %v1382_v24, %v1305_v19 }
0x16d9   :  { %v1417_v26 = vrot.slane %v1388_v23, %v3731_v21  ;;  %v1410_v48 = vcombine.high %v1388_v23, %v1388_v23 }
0x16da   :  { %v3735_v28 = vrot.slane %v1383_v25, %v3731_v21  ;;  %v1393_v20 = vcombine.high %v1383_v25, %v1383_v25 }
0x16db   :  { %v3738_v32 = vrot.slane %v1417_v26, %v3475_v18  ;;  %v3741_v31 = vrot.slane %v1417_v26, %v3487_v27  ;;  %v3743_v33 = vcombine.high %v1417_v26, %v1417_v26  ;;  %v3813_v53 = vrot.slane %v1410_v48, %v3731_v21 }
0x16dc   :  { %v3747_v34 = vrot.slane %v3735_v28, %v3487_v27  ;;  %v3759_v39 = vcombine.high %v3735_v28, %v3735_v28  ;;  %v3769_v38 = vrot.slane %v3735_v28, %v3475_v18  ;;  %v3782_v44 = vrot.slane %v1393_v20, %v3731_v21 }
0x16dd   :  { %v1662_v35 = vrot.slane %v3738_v32, %v3731_v21  ;;  %v1509_v36 = vrot.slane %v3741_v31, %v3731_v21  ;;  %v3755_v37 = vrot.slane %v3743_v33, %v3475_v18  ;;  %v3779_v43 = vrot.slane %v3743_v33, %v3487_v27 }
0x16de   :  { %v1481_v41 = vrot.slane %v3747_v34, %v3731_v21  ;;  %v3773_v42 = vrot.slane %v3759_v39, %v3487_v27  ;;  %v1634_v9 = vrot.slane %v3769_v38, %v3731_v21  ;;  %v3790_v47 = vrot.slane %v3759_v39, %v3475_v18 }
0x16df   :  { %1692 = vrot.lane.b32.xlu0 %v1662_v35, %s3394_s7  ;;  %1539 = vrot.lane.b32.xlu1 %v1509_v36, %s3394_s7  ;;  %v1669_v40 = vrot.slane %v3755_v37, %v3731_v21  ;;  %v1516_v14 = vrot.slane %v3779_v43, %v3731_v21  ;;  %v3800_v50 = vrot.slane %v3782_v44, %v3475_v18 }
0x16e0   :  { %v1488_v46 = vrot.slane %v3773_v42, %v3731_v21  ;;  %v1641_v49 = vrot.slane %v3790_v47, %v3731_v21  ;;  %v3804_v52 = vrot.slane %v3782_v44, %v3487_v27  ;;  %v3808_v51 = vcombine.high %v3782_v44, %v3782_v44 }
0x16e1   :  { %v1648_v54 = vrot.slane %v3800_v50, %v3731_v21  ;;  %v3831_v56 = vrot.slane %v3813_v53, %v3475_v18  ;;  %v3839_v58 = vrot.slane %v3813_v53, %v3487_v27  ;;  %v3843_v59 = vcombine.high %v3813_v53, %v3813_v53 }
0x16e2   :  { %v1495_v29 = vrot.slane %v3804_v52, %v3731_v21  ;;  %v3821_v30 = vrot.slane %v3808_v51, %v3475_v18  ;;  %v3825_v55 = vrot.slane %v3808_v51, %v3487_v27 }
0x16e3   :  { %1694 = vrot.lane.b32.xlu0 %v1669_v40, %s3394_s7  ;;  %1531 = vrot.lane.b32.xlu1 %v1481_v41, %s3394_s7  ;;  %v1676_v60 = vrot.slane %v3831_v56, %v3731_v21  ;;  %v1523_v61 = vrot.slane %v3839_v58, %v3731_v21  ;;  %v3853_v62 = vrot.slane %v3843_v59, %v3475_v18 }
0x16e4   :  { %v1655_v57 = vrot.slane %v3821_v30, %v3731_v21  ;;  %v1502_v45 = vrot.slane %v3825_v55, %v3731_v21  ;;  %v3857_v63 = vrot.slane %v3843_v59, %v3487_v27 }
0x16e5   :  { %v1683_v2 = vrot.slane %v3853_v62, %v3731_v21 }
0x16e6   :  { %v1530_v3 = vrot.slane %v3857_v63, %v3731_v21 }
0x16e7   :  { %1684 = vrot.lane.b32.xlu1 %v1634_v9, %s3394_s7  ;;  %1533 = vrot.lane.b32.xlu0 %v1488_v46, %s3394_s7 }
0x16eb   :  { %1541 = vrot.lane.b32.xlu1 %v1516_v14, %s3394_s7  ;;  %1686 = vrot.lane.b32.xlu0 %v1641_v49, %s3394_s7 }
0x16ef   :  { %1688 = vrot.lane.b32.xlu0 %v1648_v54, %s3394_s7  ;;  %1535 = vrot.lane.b32.xlu1 %v1495_v29, %s3394_s7 }
0x16f3   :  { %1690 = vrot.lane.b32.xlu0 %v1655_v57, %s3394_s7  ;;  %1537 = vrot.lane.b32.xlu1 %v1502_v45, %s3394_s7 }
0x16f7   :  { %1696 = vrot.lane.b32.xlu0 %v1676_v60, %s3394_s7  ;;  %1543 = vrot.lane.b32.xlu1 %v1523_v61, %s3394_s7 }
0x16fb   :  { %1698 = vrot.lane.b32.xlu0 %v1683_v2, %s3394_s7  ;;  %1545 = vrot.lane.b32.xlu1 %v1530_v3, %s3394_s7 }
0x1751   :  { %v1693_v4 = vpop.permute.xlu0 %1692  ;;  %v1540_v7 = vpop.permute.xlu1 %1539 }
0x1752   :  { %v1712_v5 = vmul.f32 %v1693_v4, %v1417_v26  ;;  %v1559_v6 = vmul.f32 %v1540_v7, %v1417_v26 }
0x1754   :  { %v1576_v8 = vsel %vm1563_vm9, %v1559_v6, 0.0  ;;  %v1728_v10 = vsel %vm1563_vm9, %v1712_v5, 0.0 }
0x1755   :  { %v1695_v11 = vpop.permute.xlu0 %1694  ;;  %v1532_v12 = vpop.permute.xlu1 %1531  ;;  %1577 = vadd.xlane.f32.xlu0 %v1576_v8  ;;  %1729 = vadd.xlane.f32.xlu1 %v1728_v10 }
0x1756   :  { %v1555_v13 = vmul.f32 %v1532_v12, %v3735_v28  ;;  %v1713_v19 = vmul.f32 %v1695_v11, %v3743_v33 }
0x1758   :  { %v1564_v22 = vsel %vm1563_vm9, %v1555_v13, 0.0  ;;  %v1731_v35 = vsel %vm1563_vm9, %v1713_v19, 0.0 }
0x1759   :  { %v1685_v23 = vpop.permute.xlu1 %1684  ;;  %v1534_v24 = vpop.permute.xlu0 %1533  ;;  %1565 = vadd.xlane.f32.xlu1 %v1564_v22 }
0x175a   :  { %v1708_v25 = vmul.f32 %v1685_v23, %v3735_v28  ;;  %v1556_v9 = vmul.f32 %v1534_v24, %v3759_v39 }
0x175c   :  { %v1716_v26 = vsel %vm1563_vm9, %v1708_v25, 0.0  ;;  %v1567_v29 = vsel %vm1563_vm9, %v1556_v9, 0.0 }
0x175d   :  { %v1542_v36 = vpop.permute.xlu1 %1541  ;;  %v1687_v20 = vpop.permute.xlu0 %1686  ;;  %1717 = vadd.xlane.f32.xlu0 %v1716_v26  ;;  %1732 = vadd.xlane.f32.xlu1 %v1731_v35 }
0x175e   :  { %v1560_v40 = vmul.f32 %v1542_v36, %v3743_v33  ;;  %v1709_v41 = vmul.f32 %v1687_v20, %v3759_v39 }
0x1760   :  { %v1579_v46 = vsel %vm1563_vm9, %v1560_v40, 0.0  ;;  %v1719_v48 = vsel %vm1563_vm9, %v1709_v41, 0.0 }
0x1761   :  { %v1689_v14 = vpop.permute.xlu0 %1688  ;;  %v1536_v28 = vpop.permute.xlu1 %1535  ;;  %1580 = vadd.xlane.f32.xlu0 %v1579_v46  ;;  %1720 = vadd.xlane.f32.xlu1 %v1719_v48 }
0x1762   :  { %v1710_v49 = vmul.f32 %v1689_v14, %v3782_v44  ;;  %v1557_v54 = vmul.f32 %v1536_v28, %v3782_v44 }
0x1764   :  { %v1722_v33 = vsel %vm1563_vm9, %v1710_v49, 0.0  ;;  %v1570_v61 = vsel %vm1563_vm9, %v1557_v54, 0.0 }
0x1765   :  { %1568 = vadd.xlane.f32.xlu0 %v1567_v29  ;;  %v1691_v57 = vpop.permute.xlu0 %1690  ;;  %1723 = vadd.xlane.f32.xlu1 %v1722_v33  ;;  %v1538_v39 = vpop.permute.xlu1 %1537 }
0x1766   :  { %v1711_v45 = vmul.f32 %v1691_v57, %v3808_v51  ;;  %v1558_v60 = vmul.f32 %v1538_v39, %v3808_v51 }
0x1768   :  { %v1725_v2 = vsel %vm1563_vm9, %v1711_v45, 0.0  ;;  %v1573_v6 = vsel %vm1563_vm9, %v1558_v60, 0.0 }
0x1769   :  { %1571 = vadd.xlane.f32.xlu0 %v1570_v61  ;;  %v1697_v3 = vpop.permute.xlu0 %1696  ;;  %1726 = vadd.xlane.f32.xlu1 %v1725_v2  ;;  %v1544_v44 = vpop.permute.xlu1 %1543 }
0x176a   :  { %v1714_v4 = vmul.f32 %v1697_v3, %v3813_v53  ;;  %v1561_v7 = vmul.f32 %v1544_v44, %v3813_v53 }
0x176c   :  { %v1734_v5 = vsel %vm1563_vm9, %v1714_v4, 0.0  ;;  %v1582_v13 = vsel %vm1563_vm9, %v1561_v7, 0.0 }
0x176d   :  { %v1699_v8 = vpop.permute.xlu0 %1698  ;;  %1735 = vadd.xlane.f32.xlu1 %v1734_v5  ;;  %1574 = vadd.xlane.f32.xlu0 %v1573_v6  ;;  %v1546_v51 = vpop.permute.xlu1 %1545 }
0x176e   :  { %v1715_v10 = vmul.f32 %v1699_v8, %v3843_v59  ;;  %v1562_v11 = vmul.f32 %v1546_v51, %v3843_v59 }
0x1770   :  { %v1737_v12 = vsel %vm1563_vm9, %v1715_v10, 0.0  ;;  %v1585_v53 = vsel %vm1563_vm9, %v1562_v11, 0.0 }
0x1771   :  { %1738 = vadd.xlane.f32.xlu1 %v1737_v12  ;;  %1583 = vadd.xlane.f32.xlu0 %v1582_v13 }
0x1775   :  { %1586 = vadd.xlane.f32.xlu0 %v1585_v53 }
0x17e2   :  { %v1730_v19 = vpop.xlane.xlu1 %1729  ;;  %v1578_v22 = vpop.xlane.xlu0 %1577 }
0x17e3   :  { %v1745_v49 = vsel %vm1740_vm10, %v1578_v22, %v1730_v19 }
0x17e4   :  { %v1762_v57 = vsel %vm1749_vm11, %v1745_v49, -inf }
0x17e6   :  { %v1566_v23 = vpop.xlane.xlu1 %1565 }
0x17ea   :  { %v1718_v24 = vpop.xlane.xlu0 %1717  ;;  %v1733_v25 = vpop.xlane.xlu1 %1732 }
0x17eb   :  { %v1741_v26 = vsel %vm1740_vm10, %v1566_v23, %v1718_v24 }
0x17ec   :  { %v1750_v59 = vsel %vm1749_vm11, %v1741_v26, -inf }
0x17ed   :  { %1751 = vmax.xlane.f32.xlu0 %v1750_v59 }
0x17ee   :  { %v1581_v35 = vpop.xlane.xlu0 %1580  ;;  %v1721_v36 = vpop.xlane.xlu1 %1720 }
0x17ef   :  { %v1746_v45 = vsel %vm1740_vm10, %v1581_v35, %v1733_v25 }
0x17f0   :  { %v1765_v2 = vsel %vm1749_vm11, %v1746_v45, -inf }
0x17f2   :  { %v1569_v20 = vpop.xlane.xlu0 %1568  ;;  %v1724_v40 = vpop.xlane.xlu1 %1723 }
0x17f3   :  { %v1742_v41 = vsel %vm1740_vm10, %v1569_v20, %v1721_v36 }
0x17f4   :  { %v1753_v9 = vsel %vm1749_vm11, %v1742_v41, -inf }
0x17f5   :  { %1754 = vmax.xlane.f32.xlu1 %v1753_v9 }
0x17f6   :  { %v1572_v46 = vpop.xlane.xlu0 %1571  ;;  %v1727_v48 = vpop.xlane.xlu1 %1726 }
0x17f7   :  { %v1743_v14 = vsel %vm1740_vm10, %v1572_v46, %v1724_v40 }
0x17f8   :  { %v1756_v28 = vsel %vm1749_vm11, %v1743_v14, -inf }
0x17f9   :  { %1757 = vmax.xlane.f32.xlu0 %v1756_v28 }
0x17fa   :  { %v1575_v54 = vpop.xlane.xlu0 %1574  ;;  %v1736_v33 = vpop.xlane.xlu1 %1735 }
0x17fb   :  { %v1744_v29 = vsel %vm1740_vm10, %v1575_v54, %v1727_v48 }
0x17fc   :  { %v1759_v39 = vsel %vm1749_vm11, %v1744_v29, -inf }
0x17fd   :  { %1763 = vmax.xlane.f32.xlu0 %v1762_v57  ;;  %1760 = vmax.xlane.f32.xlu1 %v1759_v39 }
0x17fe   :  { %v1584_v60 = vpop.xlane.xlu0 %1583  ;;  %v1739_v44 = vpop.xlane.xlu1 %1738 }
0x17ff   :  { %v1747_v61 = vsel %vm1740_vm10, %v1584_v60, %v1736_v33 }
0x1800   :  { %v1768_v3 = vsel %vm1749_vm11, %v1747_v61, -inf }
0x1801   :  { %1766 = vmax.xlane.f32.xlu1 %v1765_v2  ;;  %1769 = vmax.xlane.f32.xlu0 %v1768_v3 }
0x1802   :  { %v1587_v4 = vpop.xlane.xlu0 %1586 }
0x1803   :  { %v1748_v7 = vsel %vm1740_vm10, %v1587_v4, %v1739_v44 }
0x1804   :  { %v1771_v5 = vsel %vm1749_vm11, %v1748_v7, -inf }
0x1805   :  { %1772 = vmax.xlane.f32.xlu1 %v1771_v5 }
0x187a   :  { %v1752_v6 = vpop.xlane.xlu0 %1751 }
0x187b   :  { %v1774_v8 = vsub.f32 %v1741_v26, %v1752_v6  ;;  %v3396_v6 = vmov 1  }
0x187c   :  { %3162 = vset.pattern.permute.xlu0 %v3396_v6 }
0x187d   :  { %v1782_v51 = vmul.f32 1.442695, %v1774_v8  ;;  %v3397_v8 = vmov 0  }
0x187e   :  { %3161 = vset.pattern.permute.xlu1 %v3397_v8 }
0x187f   :  { %3306 = vpow2.f32 %v1782_v51 }
0x1882   :  { %v1755_v10 = vpop.xlane.xlu1 %1754 }
0x1883   :  { %v1775_v11 = vsub.f32 %v1742_v41, %v1755_v10 }
0x1885   :  { %v1784_v12 = vmul.f32 1.442695, %v1775_v11 }
0x1886   :  { %v1758_v13 = vpop.xlane.xlu0 %1757 }
0x1887   :  { %3308 = vpow2.f32 %v1784_v12  ;;  %v1776_v53 = vsub.f32 %v1743_v14, %v1758_v13 }
0x1889   :  { %v3913_v19 = vpop.eup %3306  ;;  %v1786_v22 = vmul.f32 1.442695, %v1776_v53 }
0x188a   :  { %v1764_v23 = vpop.xlane.xlu0 %1763  ;;  %v1761_v24 = vpop.xlane.xlu1 %1760  ;;  %v1798_v25 = vsel %vm1749_vm11, %v3913_v19, 0.0 }
0x188b   :  { %3310 = vpow2.f32 %v1786_v22  ;;  %v1778_v59 = vsub.f32 %v1745_v49, %v1764_v23  ;;  %v1777_v35 = vsub.f32 %v1744_v29, %v1761_v24  ;;  %1799 = vadd.xlane.f32.xlu0 %v1798_v25 }
0x188d   :  { %v1790_v26 = vmul.f32 1.442695, %v1778_v59  ;;  %v1788_v36 = vmul.f32 1.442695, %v1777_v35 }
0x188e   :  { %v1770_v20 = vpop.xlane.xlu0 %1769  ;;  %v1767_v40 = vpop.xlane.xlu1 %1766 }
0x188f   :  { %3312 = vpow2.f32 %v1790_v26  ;;  %v1780_v41 = vsub.f32 %v1747_v61, %v1770_v20  ;;  %v1779_v9 = vsub.f32 %v1746_v45, %v1767_v40 }
0x1890   :  { %3314 = vpow2.f32 %v1788_v36 }
0x1891   :  { %v3917_v46 = vpop.eup %3308  ;;  %v1794_v48 = vmul.f32 1.442695, %v1780_v41  ;;  %v1792_v14 = vmul.f32 1.442695, %v1779_v9 }
0x1892   :  { %v1773_v28 = vpop.xlane.xlu1 %1772  ;;  %v1801_v54 = vsel %vm1749_vm11, %v3917_v46, 0.0 }
0x1893   :  { %3316 = vpow2.f32 %v1794_v48  ;;  %v1781_v49 = vsub.f32 %v1748_v7, %v1773_v28  ;;  %1802 = vadd.xlane.f32.xlu1 %v1801_v54 }
0x1894   :  { %3318 = vpow2.f32 %v1792_v14 }
0x1895   :  { %v3921_v29 = vpop.eup %3310  ;;  %v1796_v33 = vmul.f32 1.442695, %v1781_v49 }
0x1896   :  { %v1804_v57 = vsel %vm1749_vm11, %v3921_v29, 0.0 }
0x1897   :  { %3320 = vpow2.f32 %v1796_v33  ;;  %1805 = vadd.xlane.f32.xlu0 %v1804_v57  ;;  %v1951_v33 = vld [vmem:[#allocation2 + $0x58] sm:$0xff] }
0x1898   :  { %v1952_v57 = vld [vmem:[#allocation2 + $0x98] sm:$0xff] }
0x1899   :  { %v3313_v39 = vpop.eup %3312 }
0x189a   :  { %v3925_v45 = vpop.eup %3314  ;;  %v1810_v60 = vsel %vm1749_vm11, %v3313_v39, 0.0 }
0x189b   :  { %1811 = vadd.xlane.f32.xlu0 %v1810_v60  ;;  %v1807_v61 = vsel %vm1749_vm11, %v3925_v45, 0.0  ;;  %v1953_v60 = vld [vmem:[#allocation2 + $0xd8] sm:$0xff] }
0x189c   :  { %1808 = vadd.xlane.f32.xlu1 %v1807_v61 }
0x189d   :  { %v3317_v2 = vpop.eup %3316 }
0x189e   :  { %v3319_v3 = vpop.eup %3318  ;;  %v1816_v44 = vsel %vm1749_vm11, %v3317_v2, 0.0 }
0x189f   :  { %1817 = vadd.xlane.f32.xlu0 %v1816_v44  ;;  %v1813_v4 = vsel %vm1749_vm11, %v3319_v3, 0.0 }
0x18a0   :  { %1814 = vadd.xlane.f32.xlu1 %v1813_v4 }
0x18a1   :  { %v3321_v7 = vpop.eup %3320 }
0x18a2   :  { %v1819_v5 = vsel %vm1749_vm11, %v3321_v7, 0.0 }
0x18a4   :  { %1820 = vadd.xlane.f32.xlu1 %v1819_v5 }
0x1918   :  { %v1800_v51 = vpop.xlane.xlu0 %1799 }
0x1920   :  { %v1803_v11 = vpop.xlane.xlu1 %1802 }
0x1924   :  { %v1806_v10 = vpop.xlane.xlu0 %1805 }
0x1928   :  { %v1812_v12 = vpop.xlane.xlu0 %1811 }
0x1929   :  { %3322 = vrcp.f32 %v1812_v12  ;;  %v1809_v13 = vpop.xlane.xlu1 %1808 }
0x192a   :  { %3324 = vrcp.f32 %v1800_v51 }
0x192c   :  { %v1818_v53 = vpop.xlane.xlu0 %1817 }
0x192d   :  { %v1815_v22 = vpop.xlane.xlu1 %1814  ;;  %3326 = vrcp.f32 %v1818_v53 }
0x192e   :  { %3328 = vrcp.f32 %v1815_v22 }
0x1931   :  { %v1821_v23 = vpop.xlane.xlu1 %1820 }
0x1932   :  { %3330 = vrcp.f32 %v1821_v23 }
0x1933   :  { %v3323_v24 = vpop.eup %3322  ;;  %3332 = vrcp.f32 %v1803_v11 }
0x1934   :  { %v1834_v25 = vmul.f32 %v3323_v24, %v3313_v39  ;;  %v3325_v59 = vpop.eup %3324  ;;  %3334 = vrcp.f32 %v1806_v10 }
0x1935   :  { %v1830_v35 = vmul.f32 %v3325_v59, %v3913_v19  ;;  %3336 = vrcp.f32 %v1809_v13 }
0x1936   :  { %1903 = vperm.xlu0 %3162, %v1834_v25   ;;  %1860 = vperm.xlu1 %3161, %v1834_v25  }
0x1937   :  { %v3327_v26 = vpop.eup %3326 }
0x1938   :  { %v3329_v36 = vpop.eup %3328  ;;  %v1836_v20 = vmul.f32 %v3327_v26, %v3317_v2 }
0x1939   :  { %v1835_v40 = vmul.f32 %v3329_v36, %v3319_v3 }
0x193a   :  { %3163 = vset.pattern.permute.xlu0 %v3397_v8  ;;  %3164 = vset.pattern.permute.xlu1 %v3396_v6 }
0x193b   :  { %1840 = vperm.xlu0 %3163, %v1830_v35   ;;  %1887 = vperm.xlu1 %3164, %v1830_v35  }
0x193c   :  { %v3331_v41 = vpop.eup %3330 }
0x193d   :  { %v1837_v9 = vmul.f32 %v3331_v41, %v3321_v7  ;;  %v3333_v48 = vpop.eup %3332 }
0x193e   :  { %v1831_v19 = vmul.f32 %v3333_v48, %v3917_v46  ;;  %v3335_v14 = vpop.eup %3334  ;;  %v1950_v46 = vld [vmem:[#allocation2 + $0x18] sm:$0xff] }
0x193f   :  { %1870 = vperm.xlu0 %3163, %v1836_v20   ;;  %3165 = vset.pattern.permute.xlu1 %v3397_v8  ;;  %v1832_v28 = vmul.f32 %v3335_v14, %v3921_v29  ;;  %v3337_v54 = vpop.eup %3336  ;;  %v3118_v39 = vpack.c.bf16 %v1951_v33, %v1950_v46  ;;  %v3121_v29 = vpack.c.bf16 %v1953_v60, %v1952_v57  ;;  %v2035_v14 = vld [vmem:[#allocation2 + $0x60] sm:$0xff] }
0x1940   :  { %1865 = vperm.xlu1 %3165, %v1835_v40   ;;  %v1833_v49 = vmul.f32 %v3337_v54, %v3925_v45 }
0x1941   :  { %3119 = vmatpush3.bf16.msra.mxu0 %v3118_v39 }
0x1942   :  { %3120 = vmatprep.subr.bf16.mxu0 %v3391_v0 }
0x1943   :  { %3174 = vset.pattern.permute.xlu0 %v3396_v6 }
0x1944   :  { %3166 = vset.pattern.permute.xlu1 %v3396_v6  ;;  %1915 = vperm.xlu0 %3174, %v1837_v9  }
0x1945   :  { %1907 = vperm.xlu1 %3166, %v1835_v40   ;;  %3122 = vmatpush3.bf16.msra.mxu0 %v3121_v29 }
0x1946   :  { %3129 = vmatprep.subr.bf16.mxu0 %v3391_v0 }
0x1948   :  { %3175 = vset.pattern.permute.xlu0 %v3397_v8 }
0x1949   :  { %3167 = vset.pattern.permute.xlu1 %v3397_v8 }
0x194a   :  { %1845 = vperm.xlu1 %3167, %v1831_v19  }
0x194e   :  { %3168 = vset.pattern.permute.xlu1 %v3396_v6 }
0x194f   :  { %1891 = vperm.xlu1 %3168, %v1831_v19   ;;  %v2034_v19 = vld [vmem:[#allocation2 + $0x20] sm:$0xff] }
0x1953   :  { %3169 = vset.pattern.permute.xlu1 %v3397_v8 }
0x1954   :  { %1850 = vperm.xlu1 %3169, %v1832_v28  }
0x1958   :  { %3170 = vset.pattern.permute.xlu1 %v3396_v6 }
0x1959   :  { %1895 = vperm.xlu1 %3170, %v1832_v28  }
0x195d   :  { %3171 = vset.pattern.permute.xlu1 %v3397_v8 }
0x195e   :  { %1855 = vperm.xlu1 %3171, %v1833_v49  }
0x1962   :  { %3172 = vset.pattern.permute.xlu1 %v3396_v6 }
0x1963   :  { %1899 = vperm.xlu1 %3172, %v1833_v49   ;;  %v3124_v49 = vpack.c.bf16 %v2035_v14, %v2034_v19 }
0x1965   :  { %3125 = vmatpush3.bf16.msra.mxu1 %v3124_v49 }
0x1966   :  { %3126 = vmatprep.subr.bf16.mxu1 %v3391_v0 }
0x1967   :  { %1911 = vperm.xlu1 %3172, %v1836_v20  }
0x196b   :  { %3173 = vset.pattern.permute.xlu1 %v3397_v8 }
0x196c   :  { %1875 = vperm.xlu1 %3173, %v1837_v9  }
0x19b5   :  { %v1861_v45 = vpop.permute.xlu1 %1860  ;;  %v1904_v7 = vpop.permute.xlu0 %1903 }
0x19b6   :  { %v1922_v59 = vmul.f32 %v1904_v7, %v3738_v32  ;;  %v1882_v35 = vmul.f32 %v1861_v45, %v3741_v31 }
0x19b8   :  { %v1930_v40 = vadd.f32 %v1922_v59, %v1882_v35  ;;  %v2211_v35 = vld [vmem:[%s4077_s1] sm:$0xff] }
0x19ba   :  { %v1888_v61 = vpop.permute.xlu1 %1887  ;;  %v1841_v6 = vpop.permute.xlu0 %1840 }
0x19bb   :  { %v1878_v10 = vmul.f32 %v1841_v6, %v3747_v34  ;;  %v1918_v11 = vmul.f32 %v1888_v61, %v3769_v38 }
0x19bd   :  { %v1926_v24 = vadd.f32 %v1918_v11, %v1878_v10  ;;  %v2267_v11 = vld [vmem:[#allocation2 + $0x38] sm:$0xff] }
0x19be   :  { %v1871_v26 = vpop.permute.xlu0 %1870 }
0x19bf   :  { %v1866_v2 = vpop.permute.xlu1 %1865  ;;  %v1935_v34 = vsel %vm1934_vm12, %v1926_v24, 0.0  ;;  %v1884_v31 = vmul.f32 %v1871_v26, %v3839_v58  ;;  %v2269_v24 = vld [vmem:[#allocation2 + $0xb8] sm:$0xff] }
0x19c0   :  { %v1883_v32 = vmul.f32 %v1866_v2, %v3779_v43 }
0x19c3   :  { %v1916_v46 = vpop.permute.xlu0 %1915 }
0x19c4   :  { %v1908_v3 = vpop.permute.xlu1 %1907  ;;  %v1925_v39 = vmul.f32 %v1916_v46, %v3853_v62  ;;  %v2037_v62 = vld [vmem:[#allocation2 + $0xe0] sm:$0xff]  ;;  %v2798_v46 = vld.sshfl [vmem:[%s4077_s1 + $0x18] sm:$0x3 pattern:$0x76325410] }
0x19c9   :  { %v1846_v44 = vpop.permute.xlu1 %1845 }
0x19ca   :  { %v1879_v12 = vmul.f32 %v1846_v44, %v3773_v42  ;;  %v1923_v42 = vmul.f32 %v1908_v3, %v3755_v37 }
0x19cc   :  { %v1931_v28 = vadd.f32 %v1923_v42, %v1883_v32 }
0x19ce   :  { %v1892_v4 = vpop.permute.xlu1 %1891  ;;  %v1944_v58 = vsel %vm1934_vm12, %v1931_v28, 0.0 }
0x19cf   :  { %v1919_v51 = vmul.f32 %v1892_v4, %v3790_v47  ;;  %v2036_v4 = vld [vmem:[#allocation2 + $0xa0] sm:$0xff] }
0x19d0   :  { %v3127_v7 = vpack.c.bf16 %v2037_v62, %v2036_v4  ;;  %v2446_v4 = vld [vmem:[#allocation2 + $0xb0] sm:$0xff] }
0x19d1   :  { %v1927_v53 = vadd.f32 %v1919_v51, %v1879_v12  ;;  %v1957_v51 = vsub.s32 3, %v3472_v17  ;;  %v2268_v12 = vld [vmem:[#allocation2 + $0x78] sm:$0xff]  ;;  %v2447_v62 = vld [vmem:[#allocation2 + $0xf0] sm:$0xff] }
0x19d2   :  { %3128 = vmatpush3.bf16.msra.mxu1 %v3127_v7  ;;  %v3145_v7 = vpack.c.bf16 %v2447_v62, %v2446_v4 }
0x19d3   :  { %v1851_v5 = vpop.permute.xlu1 %1850  ;;  %v1936_v47 = vsel %vm1934_vm12, %v1927_v53, 0.0  ;;  %3135 = vmatprep.subr.bf16.mxu1 %v3391_v0  ;;  %v3136_v53 = vpack.c.bf16 %v2268_v12, %v2267_v11 }
0x19d4   :  { %v1880_v22 = vmul.f32 %v1851_v5, %v3804_v52  ;;  %v1937_v20 = vadd.f32 %v1936_v47, %v1935_v34  ;;  %v2117_v5 = vld [vmem:[#allocation2 + $0x68] sm:$0xff]  ;;  %v2219_v47 = vcombine.high %v2211_v35, %v2211_v35  ;;  %v2226_v34 = vrot.slane %v2211_v35, %v3731_v21 }
0x19d5   :  { %v4020_v35 = vld [vmem:[%s4079_s3 + $0x8] sm:$0xff] }
0x19d6   :  { %v2234_v26 = vcombine.high %v2226_v34, %v2226_v34 }
0x19d8   :  { %v1896_v8 = vpop.permute.xlu1 %1895 }
0x19d9   :  { %v1920_v13 = vmul.f32 %v1896_v8, %v3800_v50  ;;  %v1954_v8 = vmul.f32 8.0, %v3727_v15 }
0x19db   :  { %v1928_v25 = vadd.f32 %v1920_v13, %v1880_v22  ;;  %v1958_v10 = vrot.slane %v1954_v8, %v1957_v51 }
0x19dd   :  { %v1856_v23 = vpop.permute.xlu1 %1855  ;;  %v1938_v50 = vsel %vm1934_vm12, %v1928_v25, 0.0  ;;  %v2270_v25 = vld [vmem:[#allocation2 + $0xf8] sm:$0xff] }
0x19de   :  { %v1881_v52 = vmul.f32 %v1856_v23, %v3825_v55  ;;  %v1939_v9 = vadd.f32 %v1938_v50, %v1937_v20  ;;  %v3139_v59 = vpack.c.bf16 %v2270_v25, %v2269_v24  ;;  %v2271_v50 = vcombine.low %v2226_v34, %v2234_v26  ;;  %v2118_v20 = vld [vmem:[#allocation2 + $0xa8] sm:$0xff] }
0x19e0   :  { %v2279_v32 = vrot.slane %v2271_v50, %v3731_v21 }
0x19e2   :  { %v1900_v38 = vpop.permute.xlu1 %1899 }
0x19e3   :  { %v1921_v36 = vmul.f32 %v1900_v38, %v3821_v30  ;;  %v1942_v30 = vsel %vm1934_vm12, %v1930_v40, 0.0  ;;  %v2233_v38 = vrot.slane %v2219_v47, %v3731_v21  ;;  %v2119_v40 = vld [vmem:[#allocation2 + $0xe8] sm:$0xff]  ;;  %v2640_v47 = vrot.slane %v4020_v35, 2 }
0x19e5   :  { %v1929_v41 = vadd.f32 %v1921_v36, %v1881_v52  ;;  %v2235_v42 = vcombine.high %v2233_v38, %v2233_v38  ;;  %v2213_v36 = vld [vmem:[%s4077_s1 + $0x10] sm:$0xff]  ;;  %3147 = vpush %v2640_v47 }
0x19e6   :  { %v1912_v48 = vpop.permute.xlu1 %1911 }
0x19e7   :  { %v1940_v37 = vsel %vm1934_vm12, %v1929_v41, 0.0  ;;  %v1924_v54 = vmul.f32 %v1912_v48, %v3831_v56  ;;  %v2272_v52 = vcombine.low %v2233_v38, %v2235_v42  ;;  %v3133_v48 = vpack.c.bf16 %v2119_v40, %v2118_v20 }
0x19e8   :  { %v1941_v55 = vadd.f32 %v1940_v37, %v1939_v9  ;;  %v2250_v9 = vrot.slane %v2213_v36, %v3731_v21  ;;  %v2797_v37 = vld.sshfl [vmem:[%s4077_s1 + $0x8] sm:$0x3 pattern:$0x76325410]  ;;  %v3398_v42 = vmov 1966171168  }
0x19e9   :  { %v1932_v33 = vadd.f32 %v1924_v54, %v1884_v31  ;;  %v2286_v41 = vrot.slane %v2272_v52, %v3731_v21  ;;  %v2243_v31 = vcombine.high %v2213_v36, %v2213_v36  ;;  %v2520_v50 = vunpack.c.l.s4 %v3398_v42 }
0x19ea   :  { %v1943_v43 = vadd.f32 %v1942_v30, %v1941_v55  ;;  %v2258_v28 = vcombine.high %v2250_v9, %v2250_v9  ;;  %v2288_v54 = vcombine.low %v2797_v37, %v2250_v9 }
0x19eb   :  { %v1876_v57 = vpop.permute.xlu1 %1875  ;;  %v1946_v56 = vsel %vm1934_vm12, %v1932_v33, 0.0  ;;  %v2287_v19 = vcombine.low %v2279_v32, %v2286_v41  ;;  %v2257_v14 = vrot.slane %v2243_v31, %v3731_v21  ;;  %v2521_v32 = vunpack.c.0.s8 %v2520_v50 }
0x19ec   :  { %v1945_v60 = vadd.f32 %v1944_v58, %v1943_v43  ;;  %v1885_v29 = vmul.f32 %v1876_v57, %v3857_v63  ;;  %v2116_v63 = vld [vmem:[#allocation2 + $0x28] sm:$0xff]  ;;  %v2296_v55 = vrot.slane %v2288_v54, %v3731_v21 }
0x19ed   :  { %v3130_v6 = vpack.c.bf16 %v2117_v5, %v2116_v63  ;;  %v2289_v49 = vcombine.low %v2258_v28, %v2257_v14  ;;  %v2259_v33 = vcombine.high %v2257_v14, %v2257_v14  ;;  %v2524_v9 = vsub.s32 %v2521_v32, %v3472_v17 }
0x19ee   :  { %v1947_v45 = vadd.f32 %v1946_v56, %v1945_v60  ;;  %v1933_v61 = vadd.f32 %v1925_v39, %v1885_v29  ;;  %v2040_v39 = vsub.s32 4, %v3472_v17  ;;  %v2444_v29 = vld [vmem:[#allocation2 + $0x30] sm:$0xff] }
0x19ef   :  { %v2303_v30 = vrot.slane %v2289_v49, %v3731_v21  ;;  %v2305_v58 = vcombine.low %v2259_v33, %v2798_v46  ;;  %v2445_v56 = vld [vmem:[#allocation2 + $0x70] sm:$0xff]  ;;  %v2609_v49 = vsub.s32 7, %v3472_v17 }
0x19f0   :  { %v1948_v2 = vsel %vm1934_vm12, %v1933_v61, 0.0  ;;  %v2041_v60 = vrot.slane %v3727_v15, %v2040_v39 }
0x19f1   :  { %v1949_v3 = vadd.f32 %v1948_v2, %v1947_v45  ;;  %v2304_v43 = vcombine.low %v2296_v55, %v2303_v30  ;;  %v2312_v57 = vrot.slane %v2305_v58, %v3731_v21  ;;  %v2122_v55 = vsub.s32 5, %v3472_v17 }
0x19f3   :  { %1960 = vrot.lane.b32.xlu1 %v1949_v3, %s3390_s26  ;;  %v3142_v3 = vpack.c.bf16 %v2445_v56, %v2444_v29  ;;  %v2123_v29 = vrot.slane %v3727_v15, %v2122_v55 }
0x1a65   :  { %v1961_v44 = vpop.permute.xlu1 %1960 }
0x1a66   :  { %3001 = vmatmul.mubr.msk.f32.vlgmr.msra.gmra.mrb[10].mxu0 %vm44_vm1, %v1961_v44 }
0x1a67   :  { %3022 = vmatprep.mubr.msk.f32.mxu0 %vm3392_vm0, %v3393_v1  ;;  %3131 = vmatpush3.bf16.msra.mxu0 %v3130_v6 }
0x1a68   :  { %3132 = vmatprep.subr.bf16.mxu0 %v3391_v0 }
0x1a6b   :  { %3134 = vmatpush3.bf16.msra.mxu0 %v3133_v48 }
0x1a6c   :  { %3141 = vmatprep.subr.bf16.mxu0 %v3391_v0 }
0x1b39   :  { %v2030_v13 = vpop.f32.mrb[10].mxu0 }
0x1b3a   :  { %v2031_v22 = vadd.f32 %v2030_v13, %v1958_v10  ;;  %v3002_v23 = vpop.f32.mrb[11].mxu0 }
0x1b3c   :  { %3012 = vmatmul.mubr.msk.f32.vlgmr.msra.gmra.mrb[10].mxu1 %vm44_vm1, %v2031_v22 }
0x1b3d   :  { %3137 = vmatpush3.bf16.msra.mxu1 %v3136_v53  ;;  %3033 = vmatprep.mubr.msk.f32.mxu1 %vm3392_vm0, %v3393_v1 }
0x1b3e   :  { %3138 = vmatprep.subr.bf16.mxu1 %v3391_v0 }
0x1b41   :  { %3140 = vmatpush3.bf16.msra.mxu1 %v3139_v59 }
0x1b44   :  { %3034 = vmatmul.mubr.msk.f32.vlgmr.msra.gmra.mrb[12].mxu1 %vm44_vm1, %v2287_v19 }
0x1b45   :  { %3036 = vmatprep.mubr.msk.f32.mxu1 %vm3392_vm0, %v3393_v1 }
0x1b48   :  { %3037 = vmatmul.mubr.msk.f32.gmra.mrb[14].mxu1 %vm44_vm1, %v2304_v43 }
0x1b49   :  { %3039 = vmatprep.mubr.msk.f32.mxu1 %vm3392_vm0, %v3393_v1 }
0x1b4c   :  { %3040 = vmatmul.mubr.msk.f32.gmra.mrb[16].mxu1 %vm44_vm1, %v2312_v57 }
0x1c0f   :  { %v2111_v45 = vpop.f32.mrb[10].mxu1 }
0x1c10   :  { %v2112_v61 = vadd.f32 %v2111_v45, %v2041_v60  ;;  %v3013_v2 = vpop.f32.mrb[11].mxu1  ;;  %v2610_v60 = vrot.slane %v3727_v15, %v2609_v49 }
0x1c11   :  { %v2622_v2 = vrot.slane %v4020_v35, %v3487_v27 }
0x1c12   :  { %v2115_v44 = vmax.f32 %v2112_v61, 0.0 }
0x1c14   :  { %3023 = vmatmul.mubr.msk.f32.vlgmr.msra.gmra.mrb[12].mxu0 %vm44_vm1, %v2115_v44 }
0x1c15   :  { %3143 = vmatpush3.bf16.msra.mxu0 %v3142_v3  ;;  %3050 = vmatprep.mubr.msk.f32.mxu0 %vm3392_vm0, %v3393_v1 }
0x1c16   :  { %3144 = vmatprep.subr.bf16.mxu0 %v3391_v0 }
0x1c17   :  { %v2385_v63 = vpop.f32.mrb[12].mxu1 }
0x1c18   :  { %v3035_v5 = vpop.f32.mrb[13].mxu1  ;;  %v2402_v34 = vcombine.high %v2385_v63, %v2385_v63  ;;  %v2409_v38 = vrot.slane %v2385_v63, %v3731_v21 }
0x1c19   :  { %3146 = vmatpush3.bf16.msra.mxu0 %v3145_v7 }
0x1c1a   :  { %v2416_v26 = vrot.slane %v2402_v34, %v3731_v21  ;;  %v2417_v52 = vcombine.high %v2409_v38, %v2409_v38  ;;  %v2671_v34 = vand.u32 127, %v40_v16 }
0x1c1b   :  { %v2390_v6 = vpop.f32.mrb[14].mxu1 }
0x1c1c   :  { %3051 = vmatmul.mubr.msk.f32.vlgmr.msra.gmra.mrb[14].mxu0 %vm44_vm1, %v2115_v44  ;;  %v2419_v8 = vcombine.high %v2390_v6, %v2390_v6  ;;  %v2426_v51 = vrot.slane %v2390_v6, %v3731_v21  ;;  %v3038_v10 = vpop.f32.mrb[15].mxu1  ;;  %v2418_v36 = vcombine.high %v2416_v26, %v2416_v26  ;;  %v2551_v41 = vcombine.low %v2409_v38, %v2417_v52 }
0x1c1d   :  { %v2676_v38 = vadd.s32 4294967288, %v2671_v34 }
0x1c1e   :  { %v2433_v11 = vrot.slane %v2419_v8, %v3731_v21  ;;  %v2434_v12 = vcombine.high %v2426_v51, %v2426_v51  ;;  %v2552_v31 = vcombine.low %v2416_v26, %v2418_v36  ;;  %v2559_v48 = vrot.slane %v2551_v41, %v3731_v21 }
0x1c1f   :  { %v2395_v13 = vpop.f32.mrb[16].mxu1  ;;  %v2574_v43 = vrot.slane %v2426_v51, %v3731_v21  ;;  %v2679_v52 = vsub.s32 %v2676_v38, %v3472_v17 }
0x1c20   :  { %v2575_v53 = vcombine.low %v2434_v12, %v2433_v11  ;;  %v2435_v22 = vcombine.high %v2433_v11, %v2433_v11  ;;  %v2442_v1 = vrot.slane %v2395_v13, %v3731_v21  ;;  %v3041_v23 = vpop.f32.mrb[17].mxu1  ;;  %v2566_v19 = vrot.slane %v2552_v31, %v3731_v21  ;;  %v3339_v13 = vld [vmem:[%s4079_s3] sm:$0xff]  ;;  %s3148_s3 = spop %3147 }
0x1c21   :  { %v2642_v26 = vstv %s3148_s3  ;;  %v2209_v31 = vrot.slane %v4020_v35, %v3475_v18 }
0x1c22   :  { %v2583_v0 = vrot.slane %v2575_v53, %v3731_v21  ;;  %v2576_v24 = vcombine.low %v2435_v22, %v2442_v1  ;;  %v2443_v28 = vcombine.high %v2442_v1, %v2442_v1  ;;  %v2567_v33 = vcombine.low %v2559_v48, %v2566_v19 }
0x1c24   :  { %v2590_v25 = vrot.slane %v2576_v24, %v3731_v21  ;;  %v2598_v58 = vrot.slane %v2443_v28, %v3731_v21  ;;  %v2200_v21 = vsub.s32 6, %v3472_v17 }
0x1c26   :  { %v2591_v59 = vcombine.low %v2583_v0, %v2590_v25  ;;  %v2201_v53 = vrot.slane %v3339_v13, %v2200_v21 }
0x1ce7   :  { %v2193_v20 = vpop.f32.mrb[12].mxu0 }
0x1ce8   :  { %v3024_v40 = vpop.f32.mrb[13].mxu0  ;;  %v2194_v7 = vadd.f32 %v2193_v20, %v2123_v29  ;;  %v2674_v20 = vsub.s32 %v2671_v34, %v3472_v17 }
0x1cea   :  { %v2197_v12 = vmax.f32 %v2194_v7, 0.0 }
0x1cec   :  { %v2202_v24 = vmul.f32 %v2201_v53, %v2197_v12 }
0x1cee   :  { %v2203_v47 = vsel %vm1563_vm9, %v2202_v24, 0.0 }
0x1cef   :  { %v2514_v14 = vpop.f32.mrb[14].mxu0 }
0x1cf0   :  { %v2525_v37 = vrot.slane %v2514_v14, %v2524_v9  ;;  %v3052_v54 = vpop.f32.mrb[15].mxu0 }
0x1cf2   :  { %v2526_v30 = vcombine.high %v2525_v37, %v2525_v37  ;;  %v2533_v46 = vrot.slane %v2525_v37, %v2524_v9 }
0x1cf4   :  { %v2540_v57 = vrot.slane %v2526_v30, %v2524_v9  ;;  %v2544_v39 = vrot.slane %v2533_v46, %v3487_v27 }
0x1cf6   :  { %v2548_v56 = vrot.slane %v2540_v57, %v3487_v27  ;;  %v2603_v45 = vadd.f32 %v2567_v33, %v2544_v39  ;;  %v2604_v61 = vadd.f32 %v2574_v43, %v2544_v39 }
0x1cf8   :  { %v2612_v3 = vadd.f32 %v2610_v60, %v2604_v61  ;;  %v2611_v44 = vadd.f32 %v2610_v60, %v2603_v45  ;;  %v2606_v4 = vadd.f32 %v2598_v58, %v2548_v56  ;;  %v2605_v62 = vadd.f32 %v2591_v59, %v2548_v56 }
0x1cfa   :  { %v2616_v63 = vmax.f32 %v2612_v3, 0.0  ;;  %v2615_v5 = vmax.f32 %v2611_v44, 0.0  ;;  %v2614_v6 = vadd.f32 %v2610_v60, %v2606_v4  ;;  %v2613_v8 = vadd.f32 %v2610_v60, %v2605_v62 }
0x1cfc   :  { %v2624_v51 = vmul.f32 %v2622_v2, %v2616_v63  ;;  %v2623_v15 = vmul.f32 %v2622_v2, %v2615_v5  ;;  %v2618_v10 = vmax.f32 %v2614_v6, 0.0  ;;  %v2617_v11 = vmax.f32 %v2613_v8, 0.0 }
0x1cfe   :  { %v2630_v22 = vsel %vm1563_vm9, %v2624_v51, 0.0  ;;  %v2627_v1 = vsel %vm44_vm1, %v2623_v15, 0.0  ;;  %v2626_v23 = vmul.f32 %v2622_v2, %v2618_v10  ;;  %v2625_v0 = vmul.f32 %v2622_v2, %v2617_v11 }
0x1cff   :  { %2631 = vadd.xlane.f32.xlu0 %v2630_v22  ;;  %2628 = vadd.xlane.f32.xlu1 %v2627_v1 }
0x1d00   :  { %v2636_v25 = vsel %vm1563_vm9, %v2626_v23, 0.0  ;;  %v2633_v59 = vsel %vm44_vm1, %v2625_v0, 0.0 }
0x1d03   :  { %2637 = vadd.xlane.f32.xlu1 %v2636_v25  ;;  %2634 = vadd.xlane.f32.xlu0 %v2633_v59 }
0x1d07   :  { %2204 = vadd.xlane.f32.xlu0 %v2203_v47 }
0x1d8c   :  { %v2632_v42 = vpop.xlane.xlu0 %2631  ;;  %v2629_v50 = vpop.xlane.xlu1 %2628 }
0x1d8d   :  { %v2645_v36 = vadd.f32 %v2642_v26, %v2632_v42  ;;  %v2644_v40 = vadd.f32 %v2642_v26, %v2629_v50 }
0x1d8f   :  { %v2680_v9 = vrot.slane %v2645_v36, %v2679_v52  ;;  %v2675_v48 = vrot.slane %v2644_v40, %v2674_v20 }
0x1d90   :  { %v2638_v32 = vpop.xlane.xlu1 %2637  ;;  %v2635_v41 = vpop.xlane.xlu0 %2634 }
0x1d91   :  { %v2647_v19 = vadd.f32 %v2642_v26, %v2638_v32  ;;  %v2646_v16 = vadd.f32 %v2642_v26, %v2635_v41  ;;  %v2682_v49 = vsel %vm2681_vm13, %v2680_v9, %v2675_v48 }
0x1d93   :  { %v2690_v14 = vrot.slane %v2647_v19, %v2679_v52  ;;  %v2686_v28 = vrot.slane %v2646_v16, %v2674_v20 }
0x1d94   :  { %v2205_v37 = vpop.xlane.xlu0 %2204 }
0x1d95   :  { %v2210_v54 = vadd.f32 %v2209_v31, %v2205_v37  ;;  %v2691_v17 = vsel %vm2681_vm13, %v2690_v14, %v2686_v28 }
0x1d96   :  { %v2692_v55 = vsel %vm266_vm2, %v2691_v17, %v2682_v49 }
0x1d97   :  { %2650 = vperm.xlu0 %3175, %v2210_v54   ;;  %v2695_v30 = vsel %vm2694_vm14, %v2692_v55, 0.0 }
0x1d98   :  { %2696 = vadd.xlane.f32.xlu1 %v2695_v30 }
0x1e16   :  { %v2651_v35 = vpop.permute.xlu0 %2650 }
0x1e17   :  { %v2655_v46 = vrot.slane %v2651_v35, %v3487_v27  ;;  %v2659_v60 = vrot.slane %v2651_v35, %v3475_v18 }
0x1e19   :  { %v2662_v58 = vadd.f32 %v2655_v46, %v2644_v40  ;;  %v2663_v29 = vadd.f32 %v2655_v46, %v2645_v36  ;;  %v2664_v61 = vadd.f32 %v2659_v60, %v2646_v16  ;;  %v2665_v3 = vadd.f32 %v2659_v60, %v2647_v19 }
0x1e25   :  { %v2697_v33 = vpop.xlane.xlu1 %2696 }
0x1e26   :  { %v2699_v43 = vmul.f32 0.1, %v2697_v33 }
0x1e28   :  { %v2704_v57 = vrot.slane %v2699_v43, %v3487_v27  ;;  %v2708_v56 = vrot.slane %v2699_v43, %v3475_v18 }
0x1e2a   :  { %v2711_v39 = vsub.f32 %v2662_v58, %v2704_v57  ;;  %v2712_v45 = vsub.f32 %v2663_v29, %v2704_v57  ;;  %v2713_v2 = vsub.f32 %v2664_v61, %v2708_v56  ;;  %v2714_v44 = vsub.f32 %v2665_v3, %v2708_v56 }
0x1e2c   :  { %2720 = vperm.xlu1 %3173, %v2711_v39  }
0x1e30   :  { %2723 = vperm.xlu1 %3173, %v2712_v45  }
0x1e34   :  { %2726 = vperm.xlu1 %3173, %v2713_v2  }
0x1e38   :  { %2729 = vperm.xlu1 %3173, %v2714_v44  }
0x1eab   :  { %v2721_v4 = vpop.permute.xlu1 %2720 }
0x1eac   :  { %v2734_v63 = vrot.slane %v2721_v4, %v2674_v20 }
0x1eaf   :  { %v2724_v62 = vpop.permute.xlu1 %2723 }
0x1eb0   :  { %v2738_v21 = vrot.slane %v2724_v62, %v2679_v52 }
0x1eb2   :  { %v2739_v18 = vsel %vm2681_vm13, %v2738_v21, %v2734_v63 }
0x1eb3   :  { %v2727_v7 = vpop.permute.xlu1 %2726 }
0x1eb4   :  { %v2743_v5 = vrot.slane %v2727_v7, %v2674_v20 }
0x1eb7   :  { %v2730_v27 = vpop.permute.xlu1 %2729 }
0x1eb8   :  { %v2747_v6 = vrot.slane %v2730_v27, %v2679_v52 }
0x1eba   :  { %v2748_v8 = vsel %vm2681_vm13, %v2747_v6, %v2743_v5 }
0x1ebb   :  { %v2749_v51 = vsel %vm266_vm2, %v2748_v8, %v2739_v18 }
0x1ebc   :  { %2751 = vst.msk [vmem:[#allocation5] sm:$0x3] %vm2694_vm14, %v2749_v51 }
0x1ebd   :  { %3373 = shalt.err (!%p3370_p12)
}
0x1ebe   :  { %s3374_s26 = scalar_lea.hbm %s4080_s4, 32 }
0x1ebf   :  { %p3375_p13 = scmp.ne.s32.totalorder %s4080_s4, %s3374_s26  ;;  %p3378_p0 = scmp.lt.u32.totalorder %s3374_s26, %s4080_s4 }
0x1ec1   :  { %p3380_p1 = pnand %p3378_p0, %p3375_p13 }
0x1ec3   :  { %3383 = shalt.err (!%p3380_p1)
}
0x1ec4   :  { %2761 = dma.vmem_to_hbm [thread:$0]  %s2759_s22, 32, %s4080_s4, [#allocation4]  }
0x1ec5   :  { %3386 = dma.done.wait [#allocation4], 32  }
0x1ec6   :  { %3387 = vsyncadd [#allocation4], 4294967264 }
0x1ec7   :  { %2765 = vsyncpa [#allocation3], 1 }
0x1ec8   :  { %2766 = vsyncpa [#allocation4], 1 }

</bundles_post_ra>
